<compile_context>
chip_gen: v7x
topology: tpu7x:2x2x1
jax: 0.10.0
libtpu: 0.0.40
codegen_flags: <defaults>
</compile_context>

<pallas_src>
import functools

import jax
import jax.numpy as jnp
from jax import lax
from jax.experimental import pallas as pl
from jax.experimental.pallas import tpu as pltpu


_GATE_PAD = 128  # pad each LSTM gate to one full 128-lane vreg tile


def _round_up(n, m):
    return ((n + m - 1) // m) * m


def _sigmoid(x):
    # sigmoid(x) == 0.5*tanh(0.5*x) + 0.5 : one EUP push instead of exp+recip.
    return 0.5 * jnp.tanh(0.5 * x) + 0.5


# ----------------------------------------------------------------------------
# Pallas kernel: full LSTM stack, PyTorch gate order (i, f, g, o)
# ----------------------------------------------------------------------------
def _rnnnet_stack_kernel(*refs, num_layers, seq_len, batch_blk, gp, mm_dtype,
                         return_sequence):
    """refs = (x_ref, [wih, whh, b] * L, out_ref, [seq_scratch if L > 1]).

    x_ref:   (T, B_blk, Din)     time-major, mm_dtype
    wih:     (Din_pad, 4*gp)     mm_dtype   (== W_ih^T, per-gate zero padded)
    whh:     (gp, 4*gp)          mm_dtype   (== W_hh^T, per-gate zero padded)
    b:       (1, 4*gp)           float32    (== b_ih + b_hh, per-gate padded)
    out_ref: (B_blk, gp) f32 if not return_sequence else (T, B_blk, gp) f32
    """
    T, B, GP = seq_len, batch_blk, gp
    n_in = 1 + 3 * num_layers
    x_ref = refs[0]
    out_ref = refs[n_in]
    seq_ref = refs[n_in + 1] if num_layers > 1 else None

    din = x_ref.shape[-1]
    # Collapse (T, B, Din) -> (T*B, Din); B is a multiple of 8, so this stays
    # on sublane-tile boundaries.
    cur = x_ref[...].reshape(T * B, din)

    for layer in range(num_layers):
        wih_ref = refs[1 + 3 * layer]                  # (Din_pad, 4*GP)
        whh_ref = refs[2 + 3 * layer]                  # (GP, 4*GP)
        b_ref = refs[3 + 3 * layer]                    # (1, 4*GP) f32

        # Hoisted input projection + bias: ONE MXU matmul covers all T steps.
        xg = jnp.dot(cur.astype(mm_dtype), wih_ref[...],
                     preferred_element_type=jnp.float32) + b_ref[...]

        h = jnp.zeros((B, GP), jnp.float32)
        c = jnp.zeros((B, GP), jnp.float32)
        is_final_layer = layer == num_layers - 1

        for t in range(T):  # static unroll: scheduler sees across steps
            # whh is read at the use site (not hoisted as a value) so the
            # register file stays free for h / c / gates.
            gates = xg[t * B:(t + 1) * B, :] + jnp.dot(
                h.astype(mm_dtype), whh_ref[...],
                preferred_element_type=jnp.float32)
            # Gate slices fall exactly on 128-lane tile boundaries.
            i_g = _sigmoid(gates[:, 0 * GP:1 * GP])
            f_g = _sigmoid(gates[:, 1 * GP:2 * GP])
            g_g = jnp.tanh(gates[:, 2 * GP:3 * GP])
            o_g = _sigmoid(gates[:, 3 * GP:4 * GP])
            c = f_g * c + i_g * g_g
            h = o_g * jnp.tanh(c)
            if not is_final_layer:
                seq_ref[t] = h                          # full (8,128)-tile store
            elif return_sequence:
                out_ref[t] = h.astype(out_ref.dtype)

        if not is_final_layer:
            cur = seq_ref[...].reshape(T * B, GP)       # feed next layer (VMEM)
        elif not return_sequence:
            out_ref[...] = h.astype(out_ref.dtype)      # final h only: one store


# ----------------------------------------------------------------------------
# Parameter packing: PyTorch LSTM weights -> per-gate 128-lane padded layout
# ----------------------------------------------------------------------------
def _pad_lstm_params(weight_ih, weight_hh, bias_ih, bias_hh, in_pad, gp,
                     mm_dtype):
    H = weight_ih.shape[0] // 4
    Din = weight_ih.shape[1]
    wih_t = jnp.asarray(weight_ih, jnp.float32).T      # (Din, 4H)
    whh_t = jnp.asarray(weight_hh, jnp.float32).T      # (H,  4H)
    bias = (jnp.asarray(bias_ih, jnp.float32)
            + jnp.asarray(bias_hh, jnp.float32))       # (4H,)

    wih_p = jnp.zeros((in_pad, 4 * gp), jnp.float32)
    whh_p = jnp.zeros((gp, 4 * gp), jnp.float32)
    b_p = jnp.zeros((1, 4 * gp), jnp.float32)
    for g in range(4):  # PyTorch gate order: i, f, g, o
        wih_p = wih_p.at[:Din, g * gp:g * gp + H].set(wih_t[:, g * H:(g + 1) * H])
        whh_p = whh_p.at[:H, g * gp:g * gp + H].set(whh_t[:, g * H:(g + 1) * H])
        b_p = b_p.at[0, g * gp:g * gp + H].set(bias[g * H:(g + 1) * H])
    return wih_p.astype(mm_dtype), whh_p.astype(mm_dtype), b_p


# ----------------------------------------------------------------------------
# RNNNet forward
# ----------------------------------------------------------------------------
ARCH_SETTINGS = {1: ((50,), 0.5), 2: ((100, 50), 0.5)}


def rnnnet_forward(x, params, is_last=True, mm_dtype=jnp.bfloat16,
                   batch_block=128):
    """x: (B, T, input_size). Mirrors RNNNet.forward (inference; dropout = id)."""
    B, T, D = x.shape
    GP = _GATE_PAD
    L = len(params)
    H_last = params[-1][0].shape[0] // 4

    # Cast to bf16 BEFORE the time-major transpose (halves that HBM pass),
    # then pad batch to a sublane-tile multiple so every per-step access in
    # the kernel is a full (8,128) tile.
    x_tm = jnp.transpose(jnp.asarray(x).astype(mm_dtype), (1, 0, 2))  # (T,B,D)
    b_pad8 = _round_up(B, 8)
    if b_pad8 <= batch_block:
        b_blk = b_pad8
    else:
        assert batch_block % 8 == 0
        b_blk = batch_block
    b_pad = _round_up(b_pad8, b_blk)
    if b_pad > B:
        x_tm = jnp.pad(x_tm, ((0, 0), (0, b_pad - B), (0, 0)))

    inputs = [x_tm]
    in_specs = [pl.BlockSpec((T, b_blk, D), lambda i: (0, i, 0))]
    in_pad = D
    for (wih, whh, b_ih, b_hh) in params:
        wih_p, whh_p, b_p = _pad_lstm_params(wih, whh, b_ih, b_hh, in_pad, GP,
                                             mm_dtype)
        inputs.extend([wih_p, whh_p, b_p])
        # Constant block index: weights stay VMEM-resident across grid steps.
        in_specs.extend([
            pl.BlockSpec(wih_p.shape, lambda i: (0, 0)),
            pl.BlockSpec(whh_p.shape, lambda i: (0, 0)),
            pl.BlockSpec(b_p.shape, lambda i: (0, 0)),
        ])
        in_pad = GP  # later layers consume the zero-padded (B, GP) hidden state

    return_sequence = not is_last
    if return_sequence:
        out_shape = jax.ShapeDtypeStruct((T, b_pad, GP), jnp.float32)
        out_spec = pl.BlockSpec((T, b_blk, GP), lambda i: (0, i, 0))
    else:
        out_shape = jax.ShapeDtypeStruct((b_pad, GP), jnp.float32)
        out_spec = pl.BlockSpec((b_blk, GP), lambda i: (i, 0))

    scratch = [pltpu.VMEM((T, b_blk, GP), jnp.float32)] if L > 1 else []

    kernel = functools.partial(
        _rnnnet_stack_kernel, num_layers=L, seq_len=T, batch_blk=b_blk, gp=GP,
        mm_dtype=mm_dtype, return_sequence=return_sequence)

    out = pl.pallas_call(
        kernel,
        out_shape=out_shape,
        grid_spec=pltpu.PrefetchScalarGridSpec(
            num_scalar_prefetch=0,
            grid=(b_pad // b_blk,),
            in_specs=in_specs,
            out_specs=out_spec,
            scratch_shapes=scratch),
        compiler_params=pltpu.CompilerParams(
            dimension_semantics=("parallel",)),
    )(*inputs)

    if is_last:
        # torch: transpose(1,2) -> unsqueeze(2) -> [:, :, 0, -1]  == h_T
        return out[:B, :H_last]                                  # (B, H_last)
    seq = out[:, :B, :H_last]                                    # (T, B, H)
    return jnp.transpose(seq, (1, 2, 0))[:, :, None, :]          # (B, H, 1, T)


def init_rnnnet_params(key, depth, input_size):
    """Deterministic synthetic parameters with PyTorch LSTM shapes."""
    hiddens, _dropout = ARCH_SETTINGS[depth]
    params = []
    in_sz = input_size
    for h in hiddens:
        key, k1, k2, k3, k4 = jax.random.split(key, 5)
        weight_ih = 0.1 * jax.random.normal(k1, (4 * h, in_sz), jnp.float32)
        weight_hh = 0.1 * jax.random.normal(k2, (4 * h, h), jnp.float32)
        # small nonzero biases to exercise the bias-folding path
        bias_ih = 0.05 * jax.random.normal(k3, (4 * h,), jnp.float32)
        bias_hh = 0.05 * jax.random.normal(k4, (4 * h,), jnp.float32)
        params.append((weight_ih, weight_hh, bias_ih, bias_hh))
        in_sz = h
    return params


# ----------------------------------------------------------------------------
# Pure-JAX f32 reference (lax.scan) for correctness
# ----------------------------------------------------------------------------
def _lstm_ref(x, wih, whh, b_ih, b_hh):
    H = wih.shape[0] // 4
    B = x.shape[0]

    def step(carry, x_t):
        h, c = carry
        g = x_t @ wih.T + b_ih + h @ whh.T + b_hh
        i = jax.nn.sigmoid(g[:, :H])
        f = jax.nn.sigmoid(g[:, H:2 * H])
        gg = jnp.tanh(g[:, 2 * H:3 * H])
        o = jax.nn.sigmoid(g[:, 3 * H:])
        c = f * c + i * gg
        h = o * jnp.tanh(c)
        return (h, c), h

    init = (jnp.zeros((B, H), jnp.float32), jnp.zeros((B, H), jnp.float32))
    _, ys = lax.scan(step, init, jnp.swapaxes(x, 0, 1))
    return jnp.swapaxes(ys, 0, 1)


def _rnnnet_ref(x, params, is_last=True):
    for (wih, whh, b_ih, b_hh) in params:
        x = _lstm_ref(x, wih, whh, b_ih, b_hh)
    if is_last:
        return x[:, -1, :]
    return jnp.transpose(x, (0, 2, 1))[:, :, None, :]


# ----------------------------------------------------------------------------
if __name__ == "__main__":
    key = jax.random.PRNGKey(0)
    B, T, C = 2, 8, 16                       # batch, seq_len, input_size

    k_x, k_p = jax.random.split(key)
    x = jax.random.normal(k_x, (B, T, C), jnp.float32)

    for depth in (1, 2):                     # depth=1: H=50; depth=2: 100 -> 50
        params = init_rnnnet_params(jax.random.fold_in(k_p, depth), depth, C)
        H = ARCH_SETTINGS[depth][0][-1]

        # is_last=True path: final hidden state only, (B, H)
        out = jax.block_until_ready(rnnnet_forward(x, params, is_last=True))
        ref = _rnnnet_ref(x, params, is_last=True)
        assert out.shape == (B, H), out.shape
        assert jnp.allclose(out, ref, atol=3e-2, rtol=3e-2), (
            f"depth={depth} is_last=True "
            f"max_err={float(jnp.max(jnp.abs(out - ref)))}")

        # is_last=False path: full hidden sequence, (B, H, 1, T)
        seq = jax.block_until_ready(rnnnet_forward(x, params, is_last=False))
        seq_ref = _rnnnet_ref(x, params, is_last=False)
        assert seq.shape == (B, H, 1, T), seq.shape
        assert jnp.allclose(seq, seq_ref, atol=3e-2, rtol=3e-2), (
            f"depth={depth} is_last=False "
            f"max_err={float(jnp.max(jnp.abs(seq - seq_ref)))}")

    print("KERNEL_OK")
</pallas_src>

<mosaic_0001>
module attributes {stable_mosaic.version = 11 : i64} {
  func.func @_rnnnet_stack_kernel(%arg0: i32, %arg1: memref<8x8x16xbf16, #tpu.memory_space<vmem>>, %arg2: memref<16x512xbf16, #tpu.memory_space<vmem>>, %arg3: memref<128x512xbf16, #tpu.memory_space<vmem>>, %arg4: memref<1x512xf32, #tpu.memory_space<vmem>>, %arg5: memref<8x128xf32, #tpu.memory_space<vmem>>) attributes {dimension_semantics = [#tpu.dimension_semantics<parallel>], iteration_bounds = array<i64: 1>, scalar_prefetch = 0 : i64, scratch_operands = 0 : i64, tpu.core_type = #tpu.core_type<tc>, window_params = [{transform_indices = @transform_0, window_bounds = array<i64: 8, 8, 16>}, {pipeline_mode = #tpu.pipeline_mode<synchronous>, transform_indices = @transform_1, window_bounds = array<i64: 16, 512>}, {pipeline_mode = #tpu.pipeline_mode<synchronous>, transform_indices = @transform_2, window_bounds = array<i64: 128, 512>}, {pipeline_mode = #tpu.pipeline_mode<synchronous>, transform_indices = @transform_3, window_bounds = array<i64: 1, 512>}, {transform_indices = @transform_4, window_bounds = array<i64: 8, 128>}]} {
    %c0 = arith.constant 0 : index
    %c0_0 = arith.constant 0 : index
    %c0_1 = arith.constant 0 : index
    %0 = vector.load %arg1[%c0, %c0_0, %c0_1] : memref<8x8x16xbf16, #tpu.memory_space<vmem>>, vector<8x8x16xbf16>
    %1 = vector.shape_cast %0 : vector<8x8x16xbf16> to vector<64x16xbf16>
    %c0_2 = arith.constant 0 : index
    %c0_3 = arith.constant 0 : index
    %2 = vector.load %arg2[%c0_2, %c0_3] : memref<16x512xbf16, #tpu.memory_space<vmem>>, vector<16x512xbf16>
    %cst = arith.constant dense<0.000000e+00> : vector<64x512xf32>
    %3 = tpu.matmul %1, %2, %cst {dimension_numbers = #tpu.dot_dimension_numbers<[1], [0], [0], [1], [0, 0, 1, 1], [], []>} : vector<64x16xbf16>, vector<16x512xbf16>, vector<64x512xf32> -> vector<64x512xf32>
    %c0_4 = arith.constant 0 : index
    %c0_5 = arith.constant 0 : index
    %4 = vector.load %arg4[%c0_4, %c0_5] : memref<1x512xf32, #tpu.memory_space<vmem>>, vector<1x512xf32>
    %5 = vector.broadcast %4 : vector<1x512xf32> to vector<64x512xf32>
    %6 = arith.addf %3, %5 : vector<64x512xf32>
    %cst_6 = arith.constant 0.000000e+00 : f32
    %7 = vector.broadcast %cst_6 : f32 to vector<8x128xf32>
    %cst_7 = arith.constant 0.000000e+00 : f32
    %8 = vector.broadcast %cst_7 : f32 to vector<8x128xf32>
    %9 = vector.extract_strided_slice %6 {offsets = [0, 0], sizes = [8, 512], strides = [1, 1]} : vector<64x512xf32> to vector<8x512xf32>
    %10 = arith.truncf %7 : vector<8x128xf32> to vector<8x128xbf16>
    %c0_8 = arith.constant 0 : index
    %c0_9 = arith.constant 0 : index
    %11 = vector.load %arg3[%c0_8, %c0_9] : memref<128x512xbf16, #tpu.memory_space<vmem>>, vector<128x512xbf16>
    %cst_10 = arith.constant dense<0.000000e+00> : vector<8x512xf32>
    %12 = tpu.matmul %10, %11, %cst_10 {dimension_numbers = #tpu.dot_dimension_numbers<[1], [0], [0], [1], [0, 0, 1, 1], [], []>} : vector<8x128xbf16>, vector<128x512xbf16>, vector<8x512xf32> -> vector<8x512xf32>
    %13 = arith.addf %9, %12 : vector<8x512xf32>
    %14 = vector.extract_strided_slice %13 {offsets = [0, 0], sizes = [8, 128], strides = [1, 1]} : vector<8x512xf32> to vector<8x128xf32>
    %cst_11 = arith.constant 5.000000e-01 : f32
    %15 = vector.broadcast %cst_11 : f32 to vector<8x128xf32>
    %16 = arith.mulf %15, %14 : vector<8x128xf32>
    %17 = math.tanh %16 : vector<8x128xf32>
    %cst_12 = arith.constant 5.000000e-01 : f32
    %18 = vector.broadcast %cst_12 : f32 to vector<8x128xf32>
    %19 = arith.mulf %18, %17 : vector<8x128xf32>
    %cst_13 = arith.constant 5.000000e-01 : f32
    %20 = vector.broadcast %cst_13 : f32 to vector<8x128xf32>
    %21 = arith.addf %19, %20 : vector<8x128xf32>
    %22 = vector.extract_strided_slice %13 {offsets = [0, 128], sizes = [8, 128], strides = [1, 1]} : vector<8x512xf32> to vector<8x128xf32>
    %cst_14 = arith.constant 5.000000e-01 : f32
    %23 = vector.broadcast %cst_14 : f32 to vector<8x128xf32>
    %24 = arith.mulf %23, %22 : vector<8x128xf32>
    %25 = math.tanh %24 : vector<8x128xf32>
    %cst_15 = arith.constant 5.000000e-01 : f32
    %26 = vector.broadcast %cst_15 : f32 to vector<8x128xf32>
    %27 = arith.mulf %26, %25 : vector<8x128xf32>
    %cst_16 = arith.constant 5.000000e-01 : f32
    %28 = vector.broadcast %cst_16 : f32 to vector<8x128xf32>
    %29 = arith.addf %27, %28 : vector<8x128xf32>
    %30 = vector.extract_strided_slice %13 {offsets = [0, 256], sizes = [8, 128], strides = [1, 1]} : vector<8x512xf32> to vector<8x128xf32>
    %31 = math.tanh %30 : vector<8x128xf32>
    %32 = vector.extract_strided_slice %13 {offsets = [0, 384], sizes = [8, 128], strides = [1, 1]} : vector<8x512xf32> to vector<8x128xf32>
    %cst_17 = arith.constant 5.000000e-01 : f32
    %33 = vector.broadcast %cst_17 : f32 to vector<8x128xf32>
    %34 = arith.mulf %33, %32 : vector<8x128xf32>
    %35 = math.tanh %34 : vector<8x128xf32>
    %cst_18 = arith.constant 5.000000e-01 : f32
    %36 = vector.broadcast %cst_18 : f32 to vector<8x128xf32>
    %37 = arith.mulf %36, %35 : vector<8x128xf32>
    %cst_19 = arith.constant 5.000000e-01 : f32
    %38 = vector.broadcast %cst_19 : f32 to vector<8x128xf32>
    %39 = arith.addf %37, %38 : vector<8x128xf32>
    %40 = arith.mulf %29, %8 : vector<8x128xf32>
    %41 = arith.mulf %21, %31 : vector<8x128xf32>
    %42 = arith.addf %40, %41 : vector<8x128xf32>
    %43 = math.tanh %42 : vector<8x128xf32>
    %44 = arith.mulf %39, %43 : vector<8x128xf32>
    %45 = vector.extract_strided_slice %6 {offsets = [8, 0], sizes = [8, 512], strides = [1, 1]} : vector<64x512xf32> to vector<8x512xf32>
    %46 = arith.truncf %44 : vector<8x128xf32> to vector<8x128xbf16>
    %c0_20 = arith.constant 0 : index
    %c0_21 = arith.constant 0 : index
    %47 = vector.load %arg3[%c0_20, %c0_21] : memref<128x512xbf16, #tpu.memory_space<vmem>>, vector<128x512xbf16>
    %cst_22 = arith.constant dense<0.000000e+00> : vector<8x512xf32>
    %48 = tpu.matmul %46, %47, %cst_22 {dimension_numbers = #tpu.dot_dimension_numbers<[1], [0], [0], [1], [0, 0, 1, 1], [], []>} : vector<8x128xbf16>, vector<128x512xbf16>, vector<8x512xf32> -> vector<8x512xf32>
    %49 = arith.addf %45, %48 : vector<8x512xf32>
    %50 = vector.extract_strided_slice %49 {offsets = [0, 0], sizes = [8, 128], strides = [1, 1]} : vector<8x512xf32> to vector<8x128xf32>
    %cst_23 = arith.constant 5.000000e-01 : f32
    %51 = vector.broadcast %cst_23 : f32 to vector<8x128xf32>
    %52 = arith.mulf %51, %50 : vector<8x128xf32>
    %53 = math.tanh %52 : vector<8x128xf32>
    %cst_24 = arith.constant 5.000000e-01 : f32
    %54 = vector.broadcast %cst_24 : f32 to vector<8x128xf32>
    %55 = arith.mulf %54, %53 : vector<8x128xf32>
    %cst_25 = arith.constant 5.000000e-01 : f32
    %56 = vector.broadcast %cst_25 : f32 to vector<8x128xf32>
    %57 = arith.addf %55, %56 : vector<8x128xf32>
    %58 = vector.extract_strided_slice %49 {offsets = [0, 128], sizes = [8, 128], strides = [1, 1]} : vector<8x512xf32> to vector<8x128xf32>
    %cst_26 = arith.constant 5.000000e-01 : f32
    %59 = vector.broadcast %cst_26 : f32 to vector<8x128xf32>
    %60 = arith.mulf %59, %58 : vector<8x128xf32>
    %61 = math.tanh %60 : vector<8x128xf32>
    %cst_27 = arith.constant 5.000000e-01 : f32
    %62 = vector.broadcast %cst_27 : f32 to vector<8x128xf32>
    %63 = arith.mulf %62, %61 : vector<8x128xf32>
    %cst_28 = arith.constant 5.000000e-01 : f32
    %64 = vector.broadcast %cst_28 : f32 to vector<8x128xf32>
    %65 = arith.addf %63, %64 : vector<8x128xf32>
    %66 = vector.extract_strided_slice %49 {offsets = [0, 256], sizes = [8, 128], strides = [1, 1]} : vector<8x512xf32> to vector<8x128xf32>
    %67 = math.tanh %66 : vector<8x128xf32>
    %68 = vector.extract_strided_slice %49 {offsets = [0, 384], sizes = [8, 128], strides = [1, 1]} : vector<8x512xf32> to vector<8x128xf32>
    %cst_29 = arith.constant 5.000000e-01 : f32
    %69 = vector.broadcast %cst_29 : f32 to vector<8x128xf32>
    %70 = arith.mulf %69, %68 : vector<8x128xf32>
    %71 = math.tanh %70 : vector<8x128xf32>
    %cst_30 = arith.constant 5.000000e-01 : f32
    %72 = vector.broadcast %cst_30 : f32 to vector<8x128xf32>
    %73 = arith.mulf %72, %71 : vector<8x128xf32>
    %cst_31 = arith.constant 5.000000e-01 : f32
    %74 = vector.broadcast %cst_31 : f32 to vector<8x128xf32>
    %75 = arith.addf %73, %74 : vector<8x128xf32>
    %76 = arith.mulf %65, %42 : vector<8x128xf32>
    %77 = arith.mulf %57, %67 : vector<8x128xf32>
    %78 = arith.addf %76, %77 : vector<8x128xf32>
    %79 = math.tanh %78 : vector<8x128xf32>
    %80 = arith.mulf %75, %79 : vector<8x128xf32>
    %81 = vector.extract_strided_slice %6 {offsets = [16, 0], sizes = [8, 512], strides = [1, 1]} : vector<64x512xf32> to vector<8x512xf32>
    %82 = arith.truncf %80 : vector<8x128xf32> to vector<8x128xbf16>
    %c0_32 = arith.constant 0 : index
    %c0_33 = arith.constant 0 : index
    %83 = vector.load %arg3[%c0_32, %c0_33] : memref<128x512xbf16, #tpu.memory_space<vmem>>, vector<128x512xbf16>
    %cst_34 = arith.constant dense<0.000000e+00> : vector<8x512xf32>
    %84 = tpu.matmul %82, %83, %cst_34 {dimension_numbers = #tpu.dot_dimension_numbers<[1], [0], [0], [1], [0, 0, 1, 1], [], []>} : vector<8x128xbf16>, vector<128x512xbf16>, vector<8x512xf32> -> vector<8x512xf32>
    %85 = arith.addf %81, %84 : vector<8x512xf32>
    %86 = vector.extract_strided_slice %85 {offsets = [0, 0], sizes = [8, 128], strides = [1, 1]} : vector<8x512xf32> to vector<8x128xf32>
    %cst_35 = arith.constant 5.000000e-01 : f32
    %87 = vector.broadcast %cst_35 : f32 to vector<8x128xf32>
    %88 = arith.mulf %87, %86 : vector<8x128xf32>
    %89 = math.tanh %88 : vector<8x128xf32>
    %cst_36 = arith.constant 5.000000e-01 : f32
    %90 = vector.broadcast %cst_36 : f32 to vector<8x128xf32>
    %91 = arith.mulf %90, %89 : vector<8x128xf32>
    %cst_37 = arith.constant 5.000000e-01 : f32
    %92 = vector.broadcast %cst_37 : f32 to vector<8x128xf32>
    %93 = arith.addf %91, %92 : vector<8x128xf32>
    %94 = vector.extract_strided_slice %85 {offsets = [0, 128], sizes = [8, 128], strides = [1, 1]} : vector<8x512xf32> to vector<8x128xf32>
    %cst_38 = arith.constant 5.000000e-01 : f32
    %95 = vector.broadcast %cst_38 : f32 to vector<8x128xf32>
    %96 = arith.mulf %95, %94 : vector<8x128xf32>
    %97 = math.tanh %96 : vector<8x128xf32>
    %cst_39 = arith.constant 5.000000e-01 : f32
    %98 = vector.broadcast %cst_39 : f32 to vector<8x128xf32>
    %99 = arith.mulf %98, %97 : vector<8x128xf32>
    %cst_40 = arith.constant 5.000000e-01 : f32
    %100 = vector.broadcast %cst_40 : f32 to vector<8x128xf32>
    %101 = arith.addf %99, %100 : vector<8x128xf32>
    %102 = vector.extract_strided_slice %85 {offsets = [0, 256], sizes = [8, 128], strides = [1, 1]} : vector<8x512xf32> to vector<8x128xf32>
    %103 = math.tanh %102 : vector<8x128xf32>
    %104 = vector.extract_strided_slice %85 {offsets = [0, 384], sizes = [8, 128], strides = [1, 1]} : vector<8x512xf32> to vector<8x128xf32>
    %cst_41 = arith.constant 5.000000e-01 : f32
    %105 = vector.broadcast %cst_41 : f32 to vector<8x128xf32>
    %106 = arith.mulf %105, %104 : vector<8x128xf32>
    %107 = math.tanh %106 : vector<8x128xf32>
    %cst_42 = arith.constant 5.000000e-01 : f32
    %108 = vector.broadcast %cst_42 : f32 to vector<8x128xf32>
    %109 = arith.mulf %108, %107 : vector<8x128xf32>
    %cst_43 = arith.constant 5.000000e-01 : f32
    %110 = vector.broadcast %cst_43 : f32 to vector<8x128xf32>
    %111 = arith.addf %109, %110 : vector<8x128xf32>
    %112 = arith.mulf %101, %78 : vector<8x128xf32>
    %113 = arith.mulf %93, %103 : vector<8x128xf32>
    %114 = arith.addf %112, %113 : vector<8x128xf32>
    %115 = math.tanh %114 : vector<8x128xf32>
    %116 = arith.mulf %111, %115 : vector<8x128xf32>
    %117 = vector.extract_strided_slice %6 {offsets = [24, 0], sizes = [8, 512], strides = [1, 1]} : vector<64x512xf32> to vector<8x512xf32>
    %118 = arith.truncf %116 : vector<8x128xf32> to vector<8x128xbf16>
    %c0_44 = arith.constant 0 : index
    %c0_45 = arith.constant 0 : index
    %119 = vector.load %arg3[%c0_44, %c0_45] : memref<128x512xbf16, #tpu.memory_space<vmem>>, vector<128x512xbf16>
    %cst_46 = arith.constant dense<0.000000e+00> : vector<8x512xf32>
    %120 = tpu.matmul %118, %119, %cst_46 {dimension_numbers = #tpu.dot_dimension_numbers<[1], [0], [0], [1], [0, 0, 1, 1], [], []>} : vector<8x128xbf16>, vector<128x512xbf16>, vector<8x512xf32> -> vector<8x512xf32>
    %121 = arith.addf %117, %120 : vector<8x512xf32>
    %122 = vector.extract_strided_slice %121 {offsets = [0, 0], sizes = [8, 128], strides = [1, 1]} : vector<8x512xf32> to vector<8x128xf32>
    %cst_47 = arith.constant 5.000000e-01 : f32
    %123 = vector.broadcast %cst_47 : f32 to vector<8x128xf32>
    %124 = arith.mulf %123, %122 : vector<8x128xf32>
    %125 = math.tanh %124 : vector<8x128xf32>
    %cst_48 = arith.constant 5.000000e-01 : f32
    %126 = vector.broadcast %cst_48 : f32 to vector<8x128xf32>
    %127 = arith.mulf %126, %125 : vector<8x128xf32>
    %cst_49 = arith.constant 5.000000e-01 : f32
    %128 = vector.broadcast %cst_49 : f32 to vector<8x128xf32>
    %129 = arith.addf %127, %128 : vector<8x128xf32>
    %130 = vector.extract_strided_slice %121 {offsets = [0, 128], sizes = [8, 128], strides = [1, 1]} : vector<8x512xf32> to vector<8x128xf32>
    %cst_50 = arith.constant 5.000000e-01 : f32
    %131 = vector.broadcast %cst_50 : f32 to vector<8x128xf32>
    %132 = arith.mulf %131, %130 : vector<8x128xf32>
    %133 = math.tanh %132 : vector<8x128xf32>
    %cst_51 = arith.constant 5.000000e-01 : f32
    %134 = vector.broadcast %cst_51 : f32 to vector<8x128xf32>
    %135 = arith.mulf %134, %133 : vector<8x128xf32>
    %cst_52 = arith.constant 5.000000e-01 : f32
    %136 = vector.broadcast %cst_52 : f32 to vector<8x128xf32>
    %137 = arith.addf %135, %136 : vector<8x128xf32>
    %138 = vector.extract_strided_slice %121 {offsets = [0, 256], sizes = [8, 128], strides = [1, 1]} : vector<8x512xf32> to vector<8x128xf32>
    %139 = math.tanh %138 : vector<8x128xf32>
    %140 = vector.extract_strided_slice %121 {offsets = [0, 384], sizes = [8, 128], strides = [1, 1]} : vector<8x512xf32> to vector<8x128xf32>
    %cst_53 = arith.constant 5.000000e-01 : f32
    %141 = vector.broadcast %cst_53 : f32 to vector<8x128xf32>
    %142 = arith.mulf %141, %140 : vector<8x128xf32>
    %143 = math.tanh %142 : vector<8x128xf32>
    %cst_54 = arith.constant 5.000000e-01 : f32
    %144 = vector.broadcast %cst_54 : f32 to vector<8x128xf32>
    %145 = arith.mulf %144, %143 : vector<8x128xf32>
    %cst_55 = arith.constant 5.000000e-01 : f32
    %146 = vector.broadcast %cst_55 : f32 to vector<8x128xf32>
    %147 = arith.addf %145, %146 : vector<8x128xf32>
    %148 = arith.mulf %137, %114 : vector<8x128xf32>
    %149 = arith.mulf %129, %139 : vector<8x128xf32>
    %150 = arith.addf %148, %149 : vector<8x128xf32>
    %151 = math.tanh %150 : vector<8x128xf32>
    %152 = arith.mulf %147, %151 : vector<8x128xf32>
    %153 = vector.extract_strided_slice %6 {offsets = [32, 0], sizes = [8, 512], strides = [1, 1]} : vector<64x512xf32> to vector<8x512xf32>
    %154 = arith.truncf %152 : vector<8x128xf32> to vector<8x128xbf16>
    %c0_56 = arith.constant 0 : index
    %c0_57 = arith.constant 0 : index
    %155 = vector.load %arg3[%c0_56, %c0_57] : memref<128x512xbf16, #tpu.memory_space<vmem>>, vector<128x512xbf16>
    %cst_58 = arith.constant dense<0.000000e+00> : vector<8x512xf32>
    %156 = tpu.matmul %154, %155, %cst_58 {dimension_numbers = #tpu.dot_dimension_numbers<[1], [0], [0], [1], [0, 0, 1, 1], [], []>} : vector<8x128xbf16>, vector<128x512xbf16>, vector<8x512xf32> -> vector<8x512xf32>
    %157 = arith.addf %153, %156 : vector<8x512xf32>
    %158 = vector.extract_strided_slice %157 {offsets = [0, 0], sizes = [8, 128], strides = [1, 1]} : vector<8x512xf32> to vector<8x128xf32>
    %cst_59 = arith.constant 5.000000e-01 : f32
    %159 = vector.broadcast %cst_59 : f32 to vector<8x128xf32>
    %160 = arith.mulf %159, %158 : vector<8x128xf32>
    %161 = math.tanh %160 : vector<8x128xf32>
    %cst_60 = arith.constant 5.000000e-01 : f32
    %162 = vector.broadcast %cst_60 : f32 to vector<8x128xf32>
    %163 = arith.mulf %162, %161 : vector<8x128xf32>
    %cst_61 = arith.constant 5.000000e-01 : f32
    %164 = vector.broadcast %cst_61 : f32 to vector<8x128xf32>
    %165 = arith.addf %163, %164 : vector<8x128xf32>
    %166 = vector.extract_strided_slice %157 {offsets = [0, 128], sizes = [8, 128], strides = [1, 1]} : vector<8x512xf32> to vector<8x128xf32>
    %cst_62 = arith.constant 5.000000e-01 : f32
    %167 = vector.broadcast %cst_62 : f32 to vector<8x128xf32>
    %168 = arith.mulf %167, %166 : vector<8x128xf32>
    %169 = math.tanh %168 : vector<8x128xf32>
    %cst_63 = arith.constant 5.000000e-01 : f32
    %170 = vector.broadcast %cst_63 : f32 to vector<8x128xf32>
    %171 = arith.mulf %170, %169 : vector<8x128xf32>
    %cst_64 = arith.constant 5.000000e-01 : f32
    %172 = vector.broadcast %cst_64 : f32 to vector<8x128xf32>
    %173 = arith.addf %171, %172 : vector<8x128xf32>
    %174 = vector.extract_strided_slice %157 {offsets = [0, 256], sizes = [8, 128], strides = [1, 1]} : vector<8x512xf32> to vector<8x128xf32>
    %175 = math.tanh %174 : vector<8x128xf32>
    %176 = vector.extract_strided_slice %157 {offsets = [0, 384], sizes = [8, 128], strides = [1, 1]} : vector<8x512xf32> to vector<8x128xf32>
    %cst_65 = arith.constant 5.000000e-01 : f32
    %177 = vector.broadcast %cst_65 : f32 to vector<8x128xf32>
    %178 = arith.mulf %177, %176 : vector<8x128xf32>
    %179 = math.tanh %178 : vector<8x128xf32>
    %cst_66 = arith.constant 5.000000e-01 : f32
    %180 = vector.broadcast %cst_66 : f32 to vector<8x128xf32>
    %181 = arith.mulf %180, %179 : vector<8x128xf32>
    %cst_67 = arith.constant 5.000000e-01 : f32
    %182 = vector.broadcast %cst_67 : f32 to vector<8x128xf32>
    %183 = arith.addf %181, %182 : vector<8x128xf32>
    %184 = arith.mulf %173, %150 : vector<8x128xf32>
    %185 = arith.mulf %165, %175 : vector<8x128xf32>
    %186 = arith.addf %184, %185 : vector<8x128xf32>
    %187 = math.tanh %186 : vector<8x128xf32>
    %188 = arith.mulf %183, %187 : vector<8x128xf32>
    %189 = vector.extract_strided_slice %6 {offsets = [40, 0], sizes = [8, 512], strides = [1, 1]} : vector<64x512xf32> to vector<8x512xf32>
    %190 = arith.truncf %188 : vector<8x128xf32> to vector<8x128xbf16>
    %c0_68 = arith.constant 0 : index
    %c0_69 = arith.constant 0 : index
    %191 = vector.load %arg3[%c0_68, %c0_69] : memref<128x512xbf16, #tpu.memory_space<vmem>>, vector<128x512xbf16>
    %cst_70 = arith.constant dense<0.000000e+00> : vector<8x512xf32>
    %192 = tpu.matmul %190, %191, %cst_70 {dimension_numbers = #tpu.dot_dimension_numbers<[1], [0], [0], [1], [0, 0, 1, 1], [], []>} : vector<8x128xbf16>, vector<128x512xbf16>, vector<8x512xf32> -> vector<8x512xf32>
    %193 = arith.addf %189, %192 : vector<8x512xf32>
    %194 = vector.extract_strided_slice %193 {offsets = [0, 0], sizes = [8, 128], strides = [1, 1]} : vector<8x512xf32> to vector<8x128xf32>
    %cst_71 = arith.constant 5.000000e-01 : f32
    %195 = vector.broadcast %cst_71 : f32 to vector<8x128xf32>
    %196 = arith.mulf %195, %194 : vector<8x128xf32>
    %197 = math.tanh %196 : vector<8x128xf32>
    %cst_72 = arith.constant 5.000000e-01 : f32
    %198 = vector.broadcast %cst_72 : f32 to vector<8x128xf32>
    %199 = arith.mulf %198, %197 : vector<8x128xf32>
    %cst_73 = arith.constant 5.000000e-01 : f32
    %200 = vector.broadcast %cst_73 : f32 to vector<8x128xf32>
    %201 = arith.addf %199, %200 : vector<8x128xf32>
    %202 = vector.extract_strided_slice %193 {offsets = [0, 128], sizes = [8, 128], strides = [1, 1]} : vector<8x512xf32> to vector<8x128xf32>
    %cst_74 = arith.constant 5.000000e-01 : f32
    %203 = vector.broadcast %cst_74 : f32 to vector<8x128xf32>
    %204 = arith.mulf %203, %202 : vector<8x128xf32>
    %205 = math.tanh %204 : vector<8x128xf32>
    %cst_75 = arith.constant 5.000000e-01 : f32
    %206 = vector.broadcast %cst_75 : f32 to vector<8x128xf32>
    %207 = arith.mulf %206, %205 : vector<8x128xf32>
    %cst_76 = arith.constant 5.000000e-01 : f32
    %208 = vector.broadcast %cst_76 : f32 to vector<8x128xf32>
    %209 = arith.addf %207, %208 : vector<8x128xf32>
    %210 = vector.extract_strided_slice %193 {offsets = [0, 256], sizes = [8, 128], strides = [1, 1]} : vector<8x512xf32> to vector<8x128xf32>
    %211 = math.tanh %210 : vector<8x128xf32>
    %212 = vector.extract_strided_slice %193 {offsets = [0, 384], sizes = [8, 128], strides = [1, 1]} : vector<8x512xf32> to vector<8x128xf32>
    %cst_77 = arith.constant 5.000000e-01 : f32
    %213 = vector.broadcast %cst_77 : f32 to vector<8x128xf32>
    %214 = arith.mulf %213, %212 : vector<8x128xf32>
    %215 = math.tanh %214 : vector<8x128xf32>
    %cst_78 = arith.constant 5.000000e-01 : f32
    %216 = vector.broadcast %cst_78 : f32 to vector<8x128xf32>
    %217 = arith.mulf %216, %215 : vector<8x128xf32>
    %cst_79 = arith.constant 5.000000e-01 : f32
    %218 = vector.broadcast %cst_79 : f32 to vector<8x128xf32>
    %219 = arith.addf %217, %218 : vector<8x128xf32>
    %220 = arith.mulf %209, %186 : vector<8x128xf32>
    %221 = arith.mulf %201, %211 : vector<8x128xf32>
    %222 = arith.addf %220, %221 : vector<8x128xf32>
    %223 = math.tanh %222 : vector<8x128xf32>
    %224 = arith.mulf %219, %223 : vector<8x128xf32>
    %225 = vector.extract_strided_slice %6 {offsets = [48, 0], sizes = [8, 512], strides = [1, 1]} : vector<64x512xf32> to vector<8x512xf32>
    %226 = arith.truncf %224 : vector<8x128xf32> to vector<8x128xbf16>
    %c0_80 = arith.constant 0 : index
    %c0_81 = arith.constant 0 : index
    %227 = vector.load %arg3[%c0_80, %c0_81] : memref<128x512xbf16, #tpu.memory_space<vmem>>, vector<128x512xbf16>
    %cst_82 = arith.constant dense<0.000000e+00> : vector<8x512xf32>
    %228 = tpu.matmul %226, %227, %cst_82 {dimension_numbers = #tpu.dot_dimension_numbers<[1], [0], [0], [1], [0, 0, 1, 1], [], []>} : vector<8x128xbf16>, vector<128x512xbf16>, vector<8x512xf32> -> vector<8x512xf32>
    %229 = arith.addf %225, %228 : vector<8x512xf32>
    %230 = vector.extract_strided_slice %229 {offsets = [0, 0], sizes = [8, 128], strides = [1, 1]} : vector<8x512xf32> to vector<8x128xf32>
    %cst_83 = arith.constant 5.000000e-01 : f32
    %231 = vector.broadcast %cst_83 : f32 to vector<8x128xf32>
    %232 = arith.mulf %231, %230 : vector<8x128xf32>
    %233 = math.tanh %232 : vector<8x128xf32>
    %cst_84 = arith.constant 5.000000e-01 : f32
    %234 = vector.broadcast %cst_84 : f32 to vector<8x128xf32>
    %235 = arith.mulf %234, %233 : vector<8x128xf32>
    %cst_85 = arith.constant 5.000000e-01 : f32
    %236 = vector.broadcast %cst_85 : f32 to vector<8x128xf32>
    %237 = arith.addf %235, %236 : vector<8x128xf32>
    %238 = vector.extract_strided_slice %229 {offsets = [0, 128], sizes = [8, 128], strides = [1, 1]} : vector<8x512xf32> to vector<8x128xf32>
    %cst_86 = arith.constant 5.000000e-01 : f32
    %239 = vector.broadcast %cst_86 : f32 to vector<8x128xf32>
    %240 = arith.mulf %239, %238 : vector<8x128xf32>
    %241 = math.tanh %240 : vector<8x128xf32>
    %cst_87 = arith.constant 5.000000e-01 : f32
    %242 = vector.broadcast %cst_87 : f32 to vector<8x128xf32>
    %243 = arith.mulf %242, %241 : vector<8x128xf32>
    %cst_88 = arith.constant 5.000000e-01 : f32
    %244 = vector.broadcast %cst_88 : f32 to vector<8x128xf32>
    %245 = arith.addf %243, %244 : vector<8x128xf32>
    %246 = vector.extract_strided_slice %229 {offsets = [0, 256], sizes = [8, 128], strides = [1, 1]} : vector<8x512xf32> to vector<8x128xf32>
    %247 = math.tanh %246 : vector<8x128xf32>
    %248 = vector.extract_strided_slice %229 {offsets = [0, 384], sizes = [8, 128], strides = [1, 1]} : vector<8x512xf32> to vector<8x128xf32>
    %cst_89 = arith.constant 5.000000e-01 : f32
    %249 = vector.broadcast %cst_89 : f32 to vector<8x128xf32>
    %250 = arith.mulf %249, %248 : vector<8x128xf32>
    %251 = math.tanh %250 : vector<8x128xf32>
    %cst_90 = arith.constant 5.000000e-01 : f32
    %252 = vector.broadcast %cst_90 : f32 to vector<8x128xf32>
    %253 = arith.mulf %252, %251 : vector<8x128xf32>
    %cst_91 = arith.constant 5.000000e-01 : f32
    %254 = vector.broadcast %cst_91 : f32 to vector<8x128xf32>
    %255 = arith.addf %253, %254 : vector<8x128xf32>
    %256 = arith.mulf %245, %222 : vector<8x128xf32>
    %257 = arith.mulf %237, %247 : vector<8x128xf32>
    %258 = arith.addf %256, %257 : vector<8x128xf32>
    %259 = math.tanh %258 : vector<8x128xf32>
    %260 = arith.mulf %255, %259 : vector<8x128xf32>
    %261 = vector.extract_strided_slice %6 {offsets = [56, 0], sizes = [8, 512], strides = [1, 1]} : vector<64x512xf32> to vector<8x512xf32>
    %262 = arith.truncf %260 : vector<8x128xf32> to vector<8x128xbf16>
    %c0_92 = arith.constant 0 : index
    %c0_93 = arith.constant 0 : index
    %263 = vector.load %arg3[%c0_92, %c0_93] : memref<128x512xbf16, #tpu.memory_space<vmem>>, vector<128x512xbf16>
    %cst_94 = arith.constant dense<0.000000e+00> : vector<8x512xf32>
    %264 = tpu.matmul %262, %263, %cst_94 {dimension_numbers = #tpu.dot_dimension_numbers<[1], [0], [0], [1], [0, 0, 1, 1], [], []>} : vector<8x128xbf16>, vector<128x512xbf16>, vector<8x512xf32> -> vector<8x512xf32>
    %265 = arith.addf %261, %264 : vector<8x512xf32>
    %266 = vector.extract_strided_slice %265 {offsets = [0, 0], sizes = [8, 128], strides = [1, 1]} : vector<8x512xf32> to vector<8x128xf32>
    %cst_95 = arith.constant 5.000000e-01 : f32
    %267 = vector.broadcast %cst_95 : f32 to vector<8x128xf32>
    %268 = arith.mulf %267, %266 : vector<8x128xf32>
    %269 = math.tanh %268 : vector<8x128xf32>
    %cst_96 = arith.constant 5.000000e-01 : f32
    %270 = vector.broadcast %cst_96 : f32 to vector<8x128xf32>
    %271 = arith.mulf %270, %269 : vector<8x128xf32>
    %cst_97 = arith.constant 5.000000e-01 : f32
    %272 = vector.broadcast %cst_97 : f32 to vector<8x128xf32>
    %273 = arith.addf %271, %272 : vector<8x128xf32>
    %274 = vector.extract_strided_slice %265 {offsets = [0, 128], sizes = [8, 128], strides = [1, 1]} : vector<8x512xf32> to vector<8x128xf32>
    %cst_98 = arith.constant 5.000000e-01 : f32
    %275 = vector.broadcast %cst_98 : f32 to vector<8x128xf32>
    %276 = arith.mulf %275, %274 : vector<8x128xf32>
    %277 = math.tanh %276 : vector<8x128xf32>
    %cst_99 = arith.constant 5.000000e-01 : f32
    %278 = vector.broadcast %cst_99 : f32 to vector<8x128xf32>
    %279 = arith.mulf %278, %277 : vector<8x128xf32>
    %cst_100 = arith.constant 5.000000e-01 : f32
    %280 = vector.broadcast %cst_100 : f32 to vector<8x128xf32>
    %281 = arith.addf %279, %280 : vector<8x128xf32>
    %282 = vector.extract_strided_slice %265 {offsets = [0, 256], sizes = [8, 128], strides = [1, 1]} : vector<8x512xf32> to vector<8x128xf32>
    %283 = math.tanh %282 : vector<8x128xf32>
    %284 = vector.extract_strided_slice %265 {offsets = [0, 384], sizes = [8, 128], strides = [1, 1]} : vector<8x512xf32> to vector<8x128xf32>
    %cst_101 = arith.constant 5.000000e-01 : f32
    %285 = vector.broadcast %cst_101 : f32 to vector<8x128xf32>
    %286 = arith.mulf %285, %284 : vector<8x128xf32>
    %287 = math.tanh %286 : vector<8x128xf32>
    %cst_102 = arith.constant 5.000000e-01 : f32
    %288 = vector.broadcast %cst_102 : f32 to vector<8x128xf32>
    %289 = arith.mulf %288, %287 : vector<8x128xf32>
    %cst_103 = arith.constant 5.000000e-01 : f32
    %290 = vector.broadcast %cst_103 : f32 to vector<8x128xf32>
    %291 = arith.addf %289, %290 : vector<8x128xf32>
    %292 = arith.mulf %281, %258 : vector<8x128xf32>
    %293 = arith.mulf %273, %283 : vector<8x128xf32>
    %294 = arith.addf %292, %293 : vector<8x128xf32>
    %295 = math.tanh %294 : vector<8x128xf32>
    %296 = arith.mulf %291, %295 : vector<8x128xf32>
    %c0_104 = arith.constant 0 : index
    %c0_105 = arith.constant 0 : index
    %297 = vector.load %arg5[%c0_104, %c0_105] : memref<8x128xf32, #tpu.memory_space<vmem>>, vector<8x128xf32>
    tpu.vector_store %arg5[%c0_104, %c0_105], %296 {strides = array<i32>} : memref<8x128xf32, #tpu.memory_space<vmem>>, vector<8x128xf32>,
    return
  }
  func.func @transform_0(%arg0: i32) -> (i32, i32, i32) {
    %c0_i32 = arith.constant 0 : i32
    %c0_i32_0 = arith.constant 0 : i32
    %c0_i32_1 = arith.constant 0 : i32
    return %c0_i32, %arg0, %c0_i32_0 : i32, i32, i32
  }
  func.func @transform_1(%arg0: i32) -> (i32, i32) {
    %c0_i32 = arith.constant 0 : i32
    %c0_i32_0 = arith.constant 0 : i32
    %c0_i32_1 = arith.constant 0 : i32
    return %c0_i32, %c0_i32_0 : i32, i32
  }
  func.func @transform_2(%arg0: i32) -> (i32, i32) {
    %c0_i32 = arith.constant 0 : i32
    %c0_i32_0 = arith.constant 0 : i32
    %c0_i32_1 = arith.constant 0 : i32
    return %c0_i32, %c0_i32_0 : i32, i32
  }
  func.func @transform_3(%arg0: i32) -> (i32, i32) {
    %c0_i32 = arith.constant 0 : i32
    %c0_i32_0 = arith.constant 0 : i32
    %c0_i32_1 = arith.constant 0 : i32
    return %c0_i32, %c0_i32_0 : i32, i32
  }
  func.func @transform_4(%arg0: i32) -> (i32, i32) {
    %c0_i32 = arith.constant 0 : i32
    %c0_i32_0 = arith.constant 0 : i32
    return %arg0, %c0_i32 : i32, i32
  }
}

</mosaic_0001>

<bundles_post_ra>
// kernel: tpu_custom_call.1
= control target key start
LH: loop header
LB: loop body
LE: loop exit
PB: predicated region body
PF: predicated region fallthrough
CT: control target
= control target key end

     0   :  { %9 = vsyncpa [#allocation3], 0  ;;  %s2263_s0 = inlined_call_operand.hbm [shape: bf16[8,8,16], index: 0, kind: input, shape index: {}]   ;;  %s2264_s1 = inlined_call_operand.hbm [shape: bf16[16,512], index: 1, kind: input, shape index: {}]   ;;  %s2265_s2 = inlined_call_operand.hbm [shape: bf16[128,512], index: 2, kind: input, shape index: {}]   ;;  %s2266_s3 = inlined_call_operand.vmem [shape: f32[1,512], index: 3, kind: input, shape index: {}]   ;;  %s2267_s4 = inlined_call_operand.hbm [shape: f32[8,128], index: 4, kind: output, shape index: {}]  }
   0x1   :  { %10 = vsyncpa [#allocation6], 0 }
   0x2   :  { %11 = vsyncpa [#allocation4], 0  ;;  %s1662_s15 = smov [#allocation5]   ;;  %s1568_s19 = scalar_lea.hbm %s2264_s1, 512 }
   0x3   :  { %s29_s16 = sshll.u32 %s1662_s15, 4  ;;  %p1569_p0 = scmp.ne.s32.totalorder %s2264_s1, %s1568_s19  ;;  %s30_s16 = int_to_ptr.vmem [resolvable:$true] %s29_s16 }
   0x4   :  { %p1572_p1 = scmp.lt.u32.totalorder %s1568_s19, %s2264_s1 }
   0x6   :  { %p1574_p2 = pnand %p1572_p1, %p1569_p0 }
   0x8   :  { %1577 = shalt.err (!%p1574_p2)
}
   0x9   :  { %s1578_s24 = scalar_lea.vmem %s30_s16, 512  ;;  %p1583_p4 = scmp.lt.s32.totalorder %s30_s16, %s30_s16 }
   0xa   :  { %p1579_p3 = scmp.ne.s32.totalorder %s30_s16, %s1578_s24  ;;  %p1584_p5 = scmp.lt.s32.totalorder %s1578_s24, %s1578_s24 }
   0xc   :  { %p1585_p6 = por %p1584_p5, %p1583_p4 }
   0xe   :  { %p1586_p7 = pnand %p1585_p6, %p1579_p3 }
  0x10   :  { %1589 = shalt.err (!%p1586_p7)
}
  0x11   :  { %s1663_s25 = smov 256   ;;  %s1664_s26 = smov 16  }
  0x12   :  { %35 = dma.hbm_to_vmem [thread:$0]  %s2264_s1, 512, %s30_s16, [#allocation6], %s1663_s25, %s1663_s25, %s1664_s26  }
  0x13   :  { %s1665_s29 = smov [#allocation2]   ;;  %s1590_s7 = scalar_lea.hbm %s2263_s0, 512 }
  0x14   :  { %s17_s30 = sshll.u32 %s1665_s29, 4  ;;  %p1591_p8 = scmp.ne.s32.totalorder %s2263_s0, %s1590_s7  ;;  %s18_s30 = int_to_ptr.vmem [resolvable:$true] %s17_s30 }
  0x15   :  { %p1594_p9 = scmp.lt.u32.totalorder %s1590_s7, %s2263_s0 }
  0x17   :  { %p1596_p10 = pnand %p1594_p9, %p1591_p8 }
  0x19   :  { %1599 = shalt.err (!%p1596_p10)
}
  0x1a   :  { %s1600_s12 = scalar_lea.vmem %s18_s30, 512  ;;  %p1605_p12 = scmp.lt.s32.totalorder %s18_s30, %s18_s30 }
  0x1b   :  { %p1601_p11 = scmp.ne.s32.totalorder %s18_s30, %s1600_s12  ;;  %p1606_p13 = scmp.lt.s32.totalorder %s1600_s12, %s1600_s12 }
  0x1d   :  { %p1607_p0 = por %p1606_p13, %p1605_p12 }
  0x1f   :  { %p1608_p1 = pnand %p1607_p0, %p1601_p11 }
  0x21   :  { %1611 = shalt.err (!%p1608_p1)
}
  0x22   :  { %s1666_s1 = smov 64   ;;  %s1667_s13 = smov 4  }
  0x23   :  { %23 = dma.hbm_to_vmem [thread:$0]  %s2263_s0, 512, %s18_s30, [#allocation3], %s1666_s1, %s1666_s1, %s1667_s13  }
  0x24   :  { %s1668_s16 = smov [#allocation7]   ;;  %s1612_s20 = scalar_lea.hbm %s2265_s2, 4096 }
  0x25   :  { %s41_s17 = sshll.u32 %s1668_s16, 4  ;;  %p1613_p2 = scmp.ne.s32.totalorder %s2265_s2, %s1612_s20  ;;  %s42_s17 = int_to_ptr.vmem [resolvable:$true] %s41_s17 }
  0x26   :  { %p1616_p3 = scmp.lt.u32.totalorder %s1612_s20, %s2265_s2 }
  0x28   :  { %p1618_p4 = pnand %p1616_p3, %p1613_p2 }
  0x2a   :  { %1621 = shalt.err (!%p1618_p4)
}
  0x2b   :  { %s1622_s27 = scalar_lea.vmem %s42_s17, 4096  ;;  %p1627_p6 = scmp.lt.s32.totalorder %s42_s17, %s42_s17 }
  0x2c   :  { %p1623_p5 = scmp.ne.s32.totalorder %s42_s17, %s1622_s27  ;;  %p1628_p7 = scmp.lt.s32.totalorder %s1622_s27, %s1622_s27 }
  0x2e   :  { %p1629_p8 = por %p1628_p7, %p1627_p6 }
  0x30   :  { %p1630_p9 = pnand %p1629_p8, %p1623_p5 }
  0x32   :  { %1633 = shalt.err (!%p1630_p9)
}
  0x33   :  { %47 = dma.hbm_to_vmem [thread:$0]  %s2265_s2, 4096, %s42_s17, [#allocation6], %s1663_s25, %s1663_s25, %s1664_s26  }
  0x34   :  { %1656 = dma.done.wait [#allocation3], 512  }
  0x35   :  { %1657 = vsyncadd [#allocation3], 4294966784 }
  0x36   :  { %1658 = dma.done.wait [#allocation6], 4608  }
  0x37   :  { %1659 = vsyncadd [#allocation6], 4294962688  ;;  %v2268_v0 = vmov 0   ;;  %v1398_v1 = vld [vmem:[#allocation5 + $0x4] ss:$16 sps:$4 sm:$0xff]   ;;  %vm134_vm0 = vcmask 130048   ;;  %v74_v41 = vlaneseq }
  0x38   :  { %179 = vmatprep.mubr.bf16.mxu0 %v2268_v0  ;;  %252 = vmatprep.mubr.bf16.mxu1 %v2268_v0  ;;  %v1400_v2 = vld [vmem:[#allocation5 + $0xc] ss:$16 sps:$4 sm:$0xff]   ;;  %v1402_v3 = vld [vmem:[#allocation5] ss:$16 sps:$4 sm:$0xff]   ;;  %v1403_v4 = vld [vmem:[#allocation5 + $0x8] ss:$16 sps:$4 sm:$0xff]  }
  0x39   :  { %147 = vmatprep.subr.bf16.mxu0 %v1398_v1  ;;  %220 = vmatprep.subr.bf16.mxu1 %v1400_v2  ;;  %v1404_v5 = vld [vmem:[#allocation2] sm:$0xff]   ;;  %v1742_v7 = vld [vmem:[#allocation7 + $0xc] ss:$16 sps:$4 sm:$0xff]   ;;  %v1747_v9 = vld [vmem:[#allocation7 + $0x8] ss:$16 sps:$4 sm:$0xff]   ;;  %v75_v42 = vshrl.u32 %v74_v41, 7 }
  0x3a   :  { %148 = vmatpush1.bf16.msra.mxu0 %v1402_v3  ;;  %221 = vmatpush1.bf16.msra.mxu1 %v1403_v4  ;;  %v1740_v6 = vld [vmem:[#allocation7 + $0x4] ss:$16 sps:$4 sm:$0xff]   ;;  %v1744_v8 = vld [vmem:[#allocation7] ss:$16 sps:$4 sm:$0xff]   ;;  %v1755_v11 = vld [vmem:[#allocation7 + $0x2c] ss:$16 sps:$4 sm:$0xff]  }
  0x3b   :  { %485 = vmatprep.subr.bf16.mxu0 %v1740_v6  ;;  %v1751_v10 = vld [vmem:[#allocation7 + $0x24] ss:$16 sps:$4 sm:$0xff]   ;;  %526 = vmatprep.subr.bf16.mxu1 %v1742_v7  ;;  %v1757_v12 = vld [vmem:[#allocation7 + $0x20] ss:$16 sps:$4 sm:$0xff]   ;;  %v1759_v13 = vld [vmem:[#allocation7 + $0x28] ss:$16 sps:$4 sm:$0xff]  }
  0x3c   :  { %v1417_v14 = vld [vmem:[#allocation2 + $0x8] sm:$0xff]   ;;  %v1765_v15 = vld [vmem:[#allocation7 + $0x44] ss:$16 sps:$4 sm:$0xff]   ;;  %v1771_v17 = vld [vmem:[#allocation7 + $0x40] ss:$16 sps:$4 sm:$0xff]   ;;  %v84_v43 = vsub.s32 2, %v75_v42 }
  0x3d   :  { %1349 = vmatmul.mubr.msk.bf16.vlgmr.msra.gmra.mrb[0].mxu0 %vm134_vm0, %v1404_v5  ;;  %1353 = vmatmul.mubr.msk.bf16.vlgmr.msra.gmra.mrb[0].mxu1 %vm134_vm0, %v1404_v5  ;;  %v1768_v16 = vld [vmem:[#allocation7 + $0x4c] ss:$16 sps:$4 sm:$0xff]   ;;  %v1773_v18 = vld [vmem:[#allocation7 + $0x48] ss:$16 sps:$4 sm:$0xff]   ;;  %v1777_v19 = vld [vmem:[#allocation7 + $0x64] ss:$16 sps:$4 sm:$0xff]  }
  0x3e   :  { %486 = vmatpush1.bf16.msra.mxu0 %v1744_v8  ;;  %527 = vmatpush1.bf16.msra.mxu1 %v1747_v9  ;;  %v1780_v20 = vld [vmem:[#allocation7 + $0x6c] ss:$16 sps:$4 sm:$0xff]   ;;  %v1784_v21 = vld [vmem:[#allocation7 + $0x60] ss:$16 sps:$4 sm:$0xff]   ;;  %v1787_v22 = vld [vmem:[#allocation7 + $0x68] ss:$16 sps:$4 sm:$0xff]  }
  0x3f   :  { %487 = vmatprep.subr.bf16.mxu0 %v1751_v10  ;;  %528 = vmatprep.subr.bf16.mxu1 %v1755_v11  ;;  %v1792_v23 = vld [vmem:[#allocation7 + $0x84] ss:$16 sps:$4 sm:$0xff]   ;;  %v1796_v24 = vld [vmem:[#allocation7 + $0x8c] ss:$16 sps:$4 sm:$0xff]   ;;  %v1799_v26 = vld [vmem:[#allocation7 + $0x80] ss:$16 sps:$4 sm:$0xff]  }
  0x40   :  { %189 = vmatprep.mubr.bf16.mxu0 %v2268_v0  ;;  %262 = vmatprep.mubr.bf16.mxu1 %v2268_v0  ;;  %v1430_v25 = vld [vmem:[#allocation2 + $0x10] sm:$0xff]   ;;  %v1803_v27 = vld [vmem:[#allocation7 + $0x88] ss:$16 sps:$4 sm:$0xff]   ;;  %v1808_v29 = vld [vmem:[#allocation7 + $0xac] ss:$16 sps:$4 sm:$0xff]   ;;  %v88_v44 = vsub.s32 3, %v75_v42 }
  0x41   :  { %v1805_v28 = vld [vmem:[#allocation7 + $0xa4] ss:$16 sps:$4 sm:$0xff]   ;;  %v1813_v30 = vld [vmem:[#allocation7 + $0xa0] ss:$16 sps:$4 sm:$0xff]   ;;  %v1815_v31 = vld [vmem:[#allocation7 + $0xa8] ss:$16 sps:$4 sm:$0xff]  }
  0x42   :  { %488 = vmatpush1.bf16.msra.mxu0 %v1757_v12  ;;  %529 = vmatpush1.bf16.msra.mxu1 %v1759_v13  ;;  %v1820_v32 = vld [vmem:[#allocation7 + $0xc4] ss:$16 sps:$4 sm:$0xff]   ;;  %v1824_v33 = vld [vmem:[#allocation7 + $0xcc] ss:$16 sps:$4 sm:$0xff]   ;;  %v1827_v35 = vld [vmem:[#allocation7 + $0xc0] ss:$16 sps:$4 sm:$0xff]  }
  0x43   :  { %489 = vmatprep.subr.bf16.mxu0 %v1765_v15  ;;  %530 = vmatprep.subr.bf16.mxu1 %v1768_v16  ;;  %v1443_v34 = vld [vmem:[#allocation2 + $0x18] sm:$0xff]   ;;  %v1833_v37 = vld [vmem:[#allocation7 + $0xe4] ss:$16 sps:$4 sm:$0xff]   ;;  %v1841_v39 = vld [vmem:[#allocation7 + $0xe0] ss:$16 sps:$4 sm:$0xff]   ;;  %v76_v45 = vsub.s32 0, %v75_v42 }
  0x44   :  { %v1831_v36 = vld [vmem:[#allocation7 + $0xc8] ss:$16 sps:$4 sm:$0xff]   ;;  %v1836_v38 = vld [vmem:[#allocation7 + $0xec] ss:$16 sps:$4 sm:$0xff]   ;;  %v72_v46 = vld [vmem:[%s2266_s3] sm:$0xf] }
  0x45   :  { %1350 = vmatmul.mubr.msk.bf16.gmra.mrb[4].mxu0 %vm134_vm0, %v1417_v14  ;;  %1354 = vmatmul.mubr.msk.bf16.gmra.mrb[4].mxu1 %vm134_vm0, %v1417_v14  ;;  %v1846_v40 = vld [vmem:[#allocation7 + $0xe8] ss:$16 sps:$4 sm:$0xff]   ;;  %v80_v47 = vsub.s32 1, %v75_v42  ;;  %v1893_v48 = vrot.slane %v72_v46, %v84_v43  ;;  %v1899_v51 = vrot.slane %v72_v46, %v88_v44  ;;  %v77_v52 = vrot.slane %v72_v46, %v76_v45  ;;  %s1670_s3 = smov [#allocation8]  }
  0x46   :  { %490 = vmatpush1.bf16.msra.mxu0 %v1771_v17  ;;  %199 = vmatprep.mubr.bf16.mxu0 %v2268_v0  ;;  %s1331_s26 = sshll.u32 %s1670_s3, 4  ;;  %s1332_s26 = int_to_ptr.vmem [resolvable:$true] %s1331_s26 }
  0x47   :  { %531 = vmatpush1.bf16.msra.mxu1 %v1773_v18  ;;  %491 = vmatprep.subr.bf16.mxu0 %v1777_v19  ;;  %v81_v55 = vrot.slane %v72_v46, %v80_v47  ;;  %s1634_s29 = scalar_lea.vmem %s1332_s26, 128  ;;  %p1639_p11 = scmp.lt.s32.totalorder %s1332_s26, %s1332_s26 }
  0x48   :  { %532 = vmatprep.subr.bf16.mxu1 %v1780_v20  ;;  %272 = vmatprep.mubr.bf16.mxu1 %v2268_v0  ;;  %p1635_p10 = scmp.ne.s32.totalorder %s1332_s26, %s1634_s29  ;;  %p1640_p12 = scmp.lt.s32.totalorder %s1634_s29, %s1634_s29 }
  0x4a   :  { %492 = vmatpush1.bf16.msra.mxu0 %v1784_v21  ;;  %p1641_p13 = por %p1640_p12, %p1639_p11 }
  0x4b   :  { %533 = vmatpush1.bf16.msra.mxu1 %v1787_v22  ;;  %493 = vmatprep.subr.bf16.mxu0 %v1792_v23 }
  0x4c   :  { %534 = vmatprep.subr.bf16.mxu1 %v1796_v24  ;;  %p1642_p0 = pnand %p1641_p13, %p1635_p10 }
  0x4d   :  { %1351 = vmatmul.mubr.msk.bf16.gmra.mrb[8].mxu0 %vm134_vm0, %v1430_v25  ;;  %1355 = vmatmul.mubr.msk.bf16.gmra.mrb[8].mxu1 %vm134_vm0, %v1430_v25 }
  0x4e   :  { %494 = vmatpush1.bf16.msra.mxu0 %v1799_v26  ;;  %209 = vmatprep.mubr.bf16.mxu0 %v2268_v0 }
  0x4f   :  { %535 = vmatpush1.bf16.msra.mxu1 %v1803_v27  ;;  %495 = vmatprep.subr.bf16.mxu0 %v1805_v28 }
  0x50   :  { %536 = vmatprep.subr.bf16.mxu1 %v1808_v29  ;;  %282 = vmatprep.mubr.bf16.mxu1 %v2268_v0 }
  0x52   :  { %496 = vmatpush1.bf16.msra.mxu0 %v1813_v30 }
  0x53   :  { %537 = vmatpush1.bf16.msra.mxu1 %v1815_v31  ;;  %497 = vmatprep.subr.bf16.mxu0 %v1820_v32 }
  0x54   :  { %538 = vmatprep.subr.bf16.mxu1 %v1824_v33 }
  0x55   :  { %1352 = vmatmul.mubr.msk.bf16.gmra.mrb[12].mxu0 %vm134_vm0, %v1443_v34  ;;  %1356 = vmatmul.mubr.msk.bf16.gmra.mrb[12].mxu1 %vm134_vm0, %v1443_v34 }
  0x56   :  { %498 = vmatpush1.bf16.msra.mxu0 %v1827_v35  ;;  %517 = vmatprep.mubr.bf16.mxu0 %v2268_v0 }
  0x57   :  { %539 = vmatpush1.bf16.msra.mxu1 %v1831_v36  ;;  %499 = vmatprep.subr.bf16.mxu0 %v1833_v37 }
  0x58   :  { %540 = vmatprep.subr.bf16.mxu1 %v1836_v38  ;;  %558 = vmatprep.mubr.bf16.mxu1 %v2268_v0 }
  0x5a   :  { %500 = vmatpush1.bf16.msra.mxu0 %v1841_v39 }
  0x5b   :  { %541 = vmatpush1.bf16.msra.mxu1 %v1846_v40  ;;  %590 = vmatprep.subr.bf16.mxu0 %v1740_v6 }
  0x5c   :  { %631 = vmatprep.subr.bf16.mxu1 %v1742_v7 }
  0x5d   :  { %518 = vmatmul.mubr.bf16.vlgmr.msra.gmra.mrb[16].mxu0 %v2268_v0 }
  0x5e   :  { %559 = vmatmul.mubr.bf16.vlgmr.msra.gmra.mrb[16].mxu1 %v2268_v0  ;;  %591 = vmatpush1.bf16.msra.mxu0 %v1744_v8 }
  0x5f   :  { %632 = vmatpush1.bf16.msra.mxu1 %v1747_v9  ;;  %592 = vmatprep.subr.bf16.mxu0 %v1751_v10 }
  0x60   :  { %633 = vmatprep.subr.bf16.mxu1 %v1755_v11  ;;  %622 = vmatprep.mubr.bf16.mxu0 %v2268_v0 }
  0x61   :  { %663 = vmatprep.mubr.bf16.mxu1 %v2268_v0 }
  0x62   :  { %593 = vmatpush1.bf16.msra.mxu0 %v1757_v12 }
  0x63   :  { %634 = vmatpush1.bf16.msra.mxu1 %v1759_v13  ;;  %594 = vmatprep.subr.bf16.mxu0 %v1765_v15 }
  0x64   :  { %635 = vmatprep.subr.bf16.mxu1 %v1768_v16 }
  0x66   :  { %595 = vmatpush1.bf16.msra.mxu0 %v1771_v17 }
  0x67   :  { %636 = vmatpush1.bf16.msra.mxu1 %v1773_v18  ;;  %596 = vmatprep.subr.bf16.mxu0 %v1777_v19 }
  0x68   :  { %637 = vmatprep.subr.bf16.mxu1 %v1780_v20 }
  0x6a   :  { %597 = vmatpush1.bf16.msra.mxu0 %v1784_v21 }
  0x6b   :  { %638 = vmatpush1.bf16.msra.mxu1 %v1787_v22  ;;  %598 = vmatprep.subr.bf16.mxu0 %v1792_v23 }
  0x6c   :  { %639 = vmatprep.subr.bf16.mxu1 %v1796_v24 }
  0x6e   :  { %599 = vmatpush1.bf16.msra.mxu0 %v1799_v26 }
  0x6f   :  { %640 = vmatpush1.bf16.msra.mxu1 %v1803_v27  ;;  %600 = vmatprep.subr.bf16.mxu0 %v1805_v28 }
  0x70   :  { %641 = vmatprep.subr.bf16.mxu1 %v1808_v29 }
  0x72   :  { %601 = vmatpush1.bf16.msra.mxu0 %v1813_v30 }
  0x73   :  { %642 = vmatpush1.bf16.msra.mxu1 %v1815_v31  ;;  %602 = vmatprep.subr.bf16.mxu0 %v1820_v32 }
  0x74   :  { %643 = vmatprep.subr.bf16.mxu1 %v1824_v33 }
  0x76   :  { %603 = vmatpush1.bf16.msra.mxu0 %v1827_v35 }
  0x77   :  { %644 = vmatpush1.bf16.msra.mxu1 %v1831_v36  ;;  %604 = vmatprep.subr.bf16.mxu0 %v1833_v37 }
  0x78   :  { %645 = vmatprep.subr.bf16.mxu1 %v1836_v38 }
  0x7a   :  { %605 = vmatpush1.bf16.msra.mxu0 %v1841_v39 }
  0x7b   :  { %646 = vmatpush1.bf16.msra.mxu1 %v1846_v40  ;;  %695 = vmatprep.subr.bf16.mxu0 %v1740_v6 }
  0x7c   :  { %736 = vmatprep.subr.bf16.mxu1 %v1742_v7 }
 0x110   :  { %v1895_v49 = vpop.f32.mrb[0].mxu0  ;;  %v1897_v50 = vpop.f32.mrb[0].mxu1 }
 0x111   :  { %v183_v53 = vpop.f32.mrb[1].mxu0  ;;  %v256_v54 = vpop.f32.mrb[1].mxu1 }
 0x112   :  { %v185_v56 = vpop.f32.mrb[2].mxu0  ;;  %v258_v57 = vpop.f32.mrb[2].mxu1 }
 0x113   :  { %v1901_v58 = vadd.f32 %v185_v56, %v77_v52  ;;  %v187_v59 = vpop.f32.mrb[3].mxu0  ;;  %v1904_v60 = vadd.f32 %v258_v57, %v1893_v48  ;;  %v260_v61 = vpop.f32.mrb[3].mxu1 }
 0x114   :  { %v1906_v62 = vadd.f32 %v187_v59, %v81_v55  ;;  %v1909_v63 = vadd.f32 %v260_v61, %v1899_v51 }
 0x118   :  { %v191_v1 = vpop.f32.mrb[4].mxu0  ;;  %v264_v2 = vpop.f32.mrb[4].mxu1 }
 0x119   :  { %v1911_v3 = vadd.f32 %v191_v1, %v77_v52  ;;  %v193_v4 = vpop.f32.mrb[5].mxu0  ;;  %v1914_v5 = vadd.f32 %v264_v2, %v1893_v48  ;;  %v266_v14 = vpop.f32.mrb[5].mxu1 }
 0x11a   :  { %v1916_v25 = vadd.f32 %v193_v4, %v81_v55  ;;  %v195_v34 = vpop.f32.mrb[6].mxu0  ;;  %v1919_v41 = vadd.f32 %v266_v14, %v1899_v51  ;;  %v268_v42 = vpop.f32.mrb[6].mxu1 }
 0x11b   :  { %v1921_v43 = vadd.f32 %v195_v34, %v77_v52  ;;  %v197_v44 = vpop.f32.mrb[7].mxu0  ;;  %v1924_v45 = vadd.f32 %v268_v42, %v1893_v48  ;;  %v270_v46 = vpop.f32.mrb[7].mxu1 }
 0x11c   :  { %2270 = vst [vmem:[#allocation12_spill] sm:$0xff] %v1919_v41  ;;  %v1926_v47 = vadd.f32 %v197_v44, %v81_v55  ;;  %v1929_v56 = vadd.f32 %v270_v46, %v1899_v51 }
 0x11d   :  { %2271 = vst [vmem:[#allocation13_spill] sm:$0xff] %v1921_v43  ;;  %2272 = vst [vmem:[#allocation14_spill] sm:$0xff] %v1924_v45 }
 0x11e   :  { %2273 = vst [vmem:[#allocation15_spill] sm:$0xff] %v1926_v47  ;;  %2274 = vst [vmem:[#allocation16_spill] sm:$0xff] %v1929_v56 }
 0x120   :  { %v201_v57 = vpop.f32.mrb[8].mxu0  ;;  %v274_v59 = vpop.f32.mrb[8].mxu1 }
 0x121   :  { %v1931_v61 = vadd.f32 %v201_v57, %v77_v52  ;;  %v203_v1 = vpop.f32.mrb[9].mxu0  ;;  %v1934_v2 = vadd.f32 %v274_v59, %v1893_v48  ;;  %v276_v4 = vpop.f32.mrb[9].mxu1 }
 0x122   :  { %v1936_v14 = vadd.f32 %v203_v1, %v81_v55  ;;  %v205_v34 = vpop.f32.mrb[10].mxu0  ;;  %v1939_v42 = vadd.f32 %v276_v4, %v1899_v51  ;;  %v278_v44 = vpop.f32.mrb[10].mxu1 }
 0x123   :  { %2275 = vst [vmem:[#allocation17_spill] sm:$0xff] %v1931_v61  ;;  %2276 = vst [vmem:[#allocation18_spill] sm:$0xff] %v1934_v2  ;;  %v1941_v0 = vadd.f32 %v205_v34, %v77_v52  ;;  %v207_v46 = vpop.f32.mrb[11].mxu0  ;;  %v1944_v56 = vadd.f32 %v278_v44, %v1893_v48  ;;  %v280_v57 = vpop.f32.mrb[11].mxu1 }
 0x124   :  { %2277 = vst [vmem:[#allocation19_spill] sm:$0xff] %v1936_v14  ;;  %2278 = vst [vmem:[#allocation20_spill] sm:$0xff] %v1939_v42  ;;  %v1946_v61 = vadd.f32 %v207_v46, %v81_v55  ;;  %v1949_v59 = vadd.f32 %v280_v57, %v1899_v51 }
 0x125   :  { %2279 = vst [vmem:[#allocation21_spill] sm:$0xff] %v1941_v0  ;;  %2280 = vst [vmem:[#allocation22_spill] sm:$0xff] %v1944_v56 }
 0x126   :  { %2281 = vst [vmem:[#allocation23_spill] sm:$0xff] %v1946_v61  ;;  %2282 = vst [vmem:[#allocation24_spill] sm:$0xff] %v1949_v59 }
 0x128   :  { %v211_v2 = vpop.f32.mrb[12].mxu0  ;;  %v284_v1 = vpop.f32.mrb[12].mxu1 }
 0x129   :  { %v1951_v14 = vadd.f32 %v211_v2, %v77_v52  ;;  %v213_v47 = vpop.f32.mrb[13].mxu0  ;;  %v1954_v4 = vadd.f32 %v284_v1, %v1893_v48  ;;  %v286_v34 = vpop.f32.mrb[13].mxu1 }
 0x12a   :  { %v1956_v0 = vadd.f32 %v213_v47, %v81_v55  ;;  %v215_v42 = vpop.f32.mrb[14].mxu0  ;;  %v1959_v44 = vadd.f32 %v286_v34, %v1899_v51  ;;  %v288_v46 = vpop.f32.mrb[14].mxu1  ;;  %v182_v47 = vadd.f32 %v1895_v49, %v77_v52  ;;  %v255_v34 = vadd.f32 %v1897_v50, %v1893_v48 }
 0x12b   :  { %2283 = vst [vmem:[#allocation25_spill] sm:$0xff] %v1951_v14  ;;  %2284 = vst [vmem:[#allocation26_spill] sm:$0xff] %v1954_v4  ;;  %v1961_v61 = vadd.f32 %v215_v42, %v77_v52  ;;  %v217_v57 = vpop.f32.mrb[15].mxu0  ;;  %v1964_v59 = vadd.f32 %v288_v46, %v1893_v48  ;;  %v290_v2 = vpop.f32.mrb[15].mxu1  ;;  %v257_v42 = vadd.f32 %v256_v54, %v1899_v51 }
 0x12c   :  { %2285 = vst [vmem:[#allocation27_spill] sm:$0xff] %v1956_v0  ;;  %2286 = vst [vmem:[#allocation28_spill] sm:$0xff] %v1959_v44  ;;  %v1966_v14 = vadd.f32 %v217_v57, %v81_v55  ;;  %v1969_v1 = vadd.f32 %v290_v2, %v1899_v51  ;;  %v184_v0 = vadd.f32 %v183_v53, %v81_v55 }
 0x12d   :  { %2287 = vst [vmem:[#allocation29_spill] sm:$0xff] %v1961_v61  ;;  %2288 = vst [vmem:[#allocation30_spill] sm:$0xff] %v1964_v59 }
 0x12e   :  { %2289 = vst [vmem:[#allocation31_spill] sm:$0xff] %v1966_v14  ;;  %2290 = vst [vmem:[#allocation32_spill] sm:$0xff] %v1969_v1 }
 0x130   :  { %v519_v44 = vpop.f32.mrb[16].mxu0 }
 0x131   :  { %v567_v61 = vadd.f32 %v519_v44, %v182_v47  ;;  %v560_v4 = vpop.f32.mrb[16].mxu1  ;;  %v521_v56 = vpop.f32.mrb[17].mxu0 }
 0x132   :  { %v569_v46 = vadd.f32 %v560_v4, %v255_v34  ;;  %v568_v59 = vadd.f32 %v521_v56, %v184_v0  ;;  %v562_v45 = vpop.f32.mrb[17].mxu1  ;;  %v523_v57 = vpop.f32.mrb[18].mxu0 }
 0x133   :  { %v571_v14 = vmul.f32 0.5, %v567_v61  ;;  %v570_v43 = vadd.f32 %v562_v45, %v257_v42  ;;  %v524_v2 = vpop.f32.mrb[19].mxu0  ;;  %v564_v1 = vpop.f32.mrb[18].mxu1 }
 0x134   :  { %v575_v41 = vmul.f32 0.5, %v568_v59  ;;  %v565_v49 = vpop.f32.mrb[19].mxu1  ;;  %v2291_v1 = vmov 0  }
 0x135   :  { %1456 = vtanh.f32 %v571_v14  ;;  %v580_v48 = vmul.f32 0.5, %v570_v43 }
 0x136   :  { %1458 = vtanh.f32 %v575_v41 }
 0x137   :  { %1460 = vtanh.f32 %v569_v46 }
 0x138   :  { %1462 = vtanh.f32 %v580_v48 }
 0x13f   :  { %v1457_v50 = vpop.eup %1456 }
 0x140   :  { %v1459_v52 = vpop.eup %1458  ;;  %v573_v51 = vmul.f32 0.5, %v1457_v50 }
 0x141   :  { %v577_v53 = vmul.f32 0.5, %v1459_v52  ;;  %v1461_v55 = vpop.eup %1460 }
 0x142   :  { %v574_v54 = vadd.f32 0.5, %v573_v51  ;;  %v1463_v45 = vpop.eup %1462 }
 0x143   :  { %v578_v0 = vadd.f32 0.5, %v577_v53  ;;  %v582_v59 = vmul.f32 0.5, %v1463_v45 }
 0x144   :  { %v585_v56 = vmul.f32 %v1461_v55, %v574_v54 }
 0x145   :  { %v584_v4 = vmul.f32 0.0, %v578_v0  ;;  %v583_v14 = vadd.f32 0.5, %v582_v59 }
 0x147   :  { %v1975_v61 = vadd.f32 %v585_v56, %v584_v4 }
 0x149   :  { %1464 = vtanh.f32 %v1975_v61 }
 0x153   :  { %v1465_v41 = vpop.eup %1464 }
 0x154   :  { %v588_v44 = vmul.f32 %v1465_v41, %v583_v14 }
 0x156   :  { %v589_v43 = vpack.c.bf16 %v588_v44, %v588_v44 }
 0x158   :  { %623 = vmatmul.mubr.bf16.vlgmr.msra.gmra.mrb[20].mxu0 %v589_v43  ;;  %664 = vmatmul.mubr.bf16.vlgmr.msra.gmra.mrb[20].mxu1 %v589_v43 }
 0x159   :  { %696 = vmatpush1.bf16.msra.mxu0 %v1744_v8  ;;  %737 = vmatpush1.bf16.msra.mxu1 %v1747_v9 }
 0x15a   :  { %697 = vmatprep.subr.bf16.mxu0 %v1751_v10  ;;  %738 = vmatprep.subr.bf16.mxu1 %v1755_v11 }
 0x15b   :  { %727 = vmatprep.mubr.bf16.mxu0 %v2291_v1  ;;  %768 = vmatprep.mubr.bf16.mxu1 %v2291_v1 }
 0x15d   :  { %698 = vmatpush1.bf16.msra.mxu0 %v1757_v12  ;;  %739 = vmatpush1.bf16.msra.mxu1 %v1759_v13 }
 0x15e   :  { %699 = vmatprep.subr.bf16.mxu0 %v1765_v15  ;;  %740 = vmatprep.subr.bf16.mxu1 %v1768_v16 }
 0x161   :  { %700 = vmatpush1.bf16.msra.mxu0 %v1771_v17  ;;  %741 = vmatpush1.bf16.msra.mxu1 %v1773_v18 }
 0x162   :  { %701 = vmatprep.subr.bf16.mxu0 %v1777_v19  ;;  %742 = vmatprep.subr.bf16.mxu1 %v1780_v20 }
 0x165   :  { %702 = vmatpush1.bf16.msra.mxu0 %v1784_v21  ;;  %743 = vmatpush1.bf16.msra.mxu1 %v1787_v22 }
 0x166   :  { %703 = vmatprep.subr.bf16.mxu0 %v1792_v23  ;;  %744 = vmatprep.subr.bf16.mxu1 %v1796_v24 }
 0x169   :  { %704 = vmatpush1.bf16.msra.mxu0 %v1799_v26  ;;  %745 = vmatpush1.bf16.msra.mxu1 %v1803_v27 }
 0x16a   :  { %705 = vmatprep.subr.bf16.mxu0 %v1805_v28  ;;  %746 = vmatprep.subr.bf16.mxu1 %v1808_v29 }
 0x16d   :  { %706 = vmatpush1.bf16.msra.mxu0 %v1813_v30  ;;  %747 = vmatpush1.bf16.msra.mxu1 %v1815_v31 }
 0x16e   :  { %707 = vmatprep.subr.bf16.mxu0 %v1820_v32  ;;  %748 = vmatprep.subr.bf16.mxu1 %v1824_v33 }
 0x171   :  { %708 = vmatpush1.bf16.msra.mxu0 %v1827_v35  ;;  %749 = vmatpush1.bf16.msra.mxu1 %v1831_v36 }
 0x172   :  { %709 = vmatprep.subr.bf16.mxu0 %v1833_v37  ;;  %750 = vmatprep.subr.bf16.mxu1 %v1836_v38 }
 0x175   :  { %710 = vmatpush1.bf16.msra.mxu0 %v1841_v39  ;;  %751 = vmatpush1.bf16.msra.mxu1 %v1846_v40 }
 0x176   :  { %800 = vmatprep.subr.bf16.mxu0 %v1740_v6  ;;  %841 = vmatprep.subr.bf16.mxu1 %v1742_v7 }
 0x22b   :  { %v624_v47 = vpop.f32.mrb[20].mxu0  ;;  %v665_v34 = vpop.f32.mrb[20].mxu1 }
 0x22c   :  { %v672_v42 = vadd.f32 %v624_v47, %v1901_v58  ;;  %v674_v46 = vadd.f32 %v665_v34, %v1904_v60  ;;  %v626_v57 = vpop.f32.mrb[21].mxu0  ;;  %v667_v2 = vpop.f32.mrb[21].mxu1 }
 0x22d   :  { %v673_v49 = vadd.f32 %v626_v57, %v1906_v62  ;;  %v675_v48 = vadd.f32 %v667_v2, %v1909_v63  ;;  %v628_v50 = vpop.f32.mrb[22].mxu0  ;;  %v669_v52 = vpop.f32.mrb[22].mxu1 }
 0x22e   :  { %v676_v51 = vmul.f32 0.5, %v672_v42  ;;  %v629_v53 = vpop.f32.mrb[23].mxu0  ;;  %v670_v54 = vpop.f32.mrb[23].mxu1 }
 0x22f   :  { %v680_v55 = vmul.f32 0.5, %v673_v49  ;;  %v685_v0 = vmul.f32 0.5, %v675_v48 }
 0x230   :  { %1466 = vtanh.f32 %v676_v51  ;;  %v2292_v51 = vld [vmem:[#allocation12_spill] sm:$0xff] }
 0x231   :  { %1468 = vtanh.f32 %v680_v55 }
 0x232   :  { %1470 = vtanh.f32 %v674_v46 }
 0x233   :  { %1472 = vtanh.f32 %v685_v0 }
 0x23a   :  { %v1467_v56 = vpop.eup %1466 }
 0x23b   :  { %v1469_v58 = vpop.eup %1468  ;;  %v678_v4 = vmul.f32 0.5, %v1467_v56 }
 0x23c   :  { %v682_v60 = vmul.f32 0.5, %v1469_v58  ;;  %v1471_v59 = vpop.eup %1470 }
 0x23d   :  { %v679_v45 = vadd.f32 0.5, %v678_v4  ;;  %v1473_v44 = vpop.eup %1472 }
 0x23e   :  { %v683_v62 = vadd.f32 0.5, %v682_v60  ;;  %v687_v43 = vmul.f32 0.5, %v1473_v44 }
 0x23f   :  { %v690_v14 = vmul.f32 %v1471_v59, %v679_v45 }
 0x240   :  { %v689_v63 = vmul.f32 %v683_v62, %v1975_v61  ;;  %v688_v47 = vadd.f32 0.5, %v687_v43 }
 0x242   :  { %v2017_v41 = vadd.f32 %v690_v14, %v689_v63 }
 0x244   :  { %1474 = vtanh.f32 %v2017_v41 }
 0x24e   :  { %v1475_v34 = vpop.eup %1474 }
 0x24f   :  { %v693_v42 = vmul.f32 %v1475_v34, %v688_v47 }
 0x251   :  { %v694_v46 = vpack.c.bf16 %v693_v42, %v693_v42 }
 0x253   :  { %728 = vmatmul.mubr.bf16.vlgmr.msra.gmra.mrb[24].mxu0 %v694_v46  ;;  %769 = vmatmul.mubr.bf16.vlgmr.msra.gmra.mrb[24].mxu1 %v694_v46 }
 0x254   :  { %801 = vmatpush1.bf16.msra.mxu0 %v1744_v8  ;;  %842 = vmatpush1.bf16.msra.mxu1 %v1747_v9 }
 0x255   :  { %802 = vmatprep.subr.bf16.mxu0 %v1751_v10  ;;  %843 = vmatprep.subr.bf16.mxu1 %v1755_v11 }
 0x256   :  { %832 = vmatprep.mubr.bf16.mxu0 %v2291_v1  ;;  %873 = vmatprep.mubr.bf16.mxu1 %v2291_v1 }
 0x258   :  { %803 = vmatpush1.bf16.msra.mxu0 %v1757_v12  ;;  %844 = vmatpush1.bf16.msra.mxu1 %v1759_v13 }
 0x259   :  { %804 = vmatprep.subr.bf16.mxu0 %v1765_v15  ;;  %845 = vmatprep.subr.bf16.mxu1 %v1768_v16 }
 0x25c   :  { %805 = vmatpush1.bf16.msra.mxu0 %v1771_v17  ;;  %846 = vmatpush1.bf16.msra.mxu1 %v1773_v18 }
 0x25d   :  { %806 = vmatprep.subr.bf16.mxu0 %v1777_v19  ;;  %847 = vmatprep.subr.bf16.mxu1 %v1780_v20 }
 0x260   :  { %807 = vmatpush1.bf16.msra.mxu0 %v1784_v21  ;;  %848 = vmatpush1.bf16.msra.mxu1 %v1787_v22 }
 0x261   :  { %808 = vmatprep.subr.bf16.mxu0 %v1792_v23  ;;  %849 = vmatprep.subr.bf16.mxu1 %v1796_v24 }
 0x264   :  { %809 = vmatpush1.bf16.msra.mxu0 %v1799_v26  ;;  %850 = vmatpush1.bf16.msra.mxu1 %v1803_v27 }
 0x265   :  { %810 = vmatprep.subr.bf16.mxu0 %v1805_v28  ;;  %851 = vmatprep.subr.bf16.mxu1 %v1808_v29 }
 0x268   :  { %811 = vmatpush1.bf16.msra.mxu0 %v1813_v30  ;;  %852 = vmatpush1.bf16.msra.mxu1 %v1815_v31 }
 0x269   :  { %812 = vmatprep.subr.bf16.mxu0 %v1820_v32  ;;  %853 = vmatprep.subr.bf16.mxu1 %v1824_v33 }
 0x26c   :  { %813 = vmatpush1.bf16.msra.mxu0 %v1827_v35  ;;  %854 = vmatpush1.bf16.msra.mxu1 %v1831_v36 }
 0x26d   :  { %814 = vmatprep.subr.bf16.mxu0 %v1833_v37  ;;  %855 = vmatprep.subr.bf16.mxu1 %v1836_v38 }
 0x270   :  { %815 = vmatpush1.bf16.msra.mxu0 %v1841_v39  ;;  %856 = vmatpush1.bf16.msra.mxu1 %v1846_v40 }
 0x271   :  { %905 = vmatprep.subr.bf16.mxu0 %v1740_v6  ;;  %946 = vmatprep.subr.bf16.mxu1 %v1742_v7 }
 0x326   :  { %v729_v61 = vpop.f32.mrb[24].mxu0  ;;  %v770_v57 = vpop.f32.mrb[24].mxu1 }
 0x327   :  { %v777_v2 = vadd.f32 %v729_v61, %v1911_v3  ;;  %v779_v49 = vadd.f32 %v770_v57, %v1914_v5  ;;  %v731_v48 = vpop.f32.mrb[25].mxu0  ;;  %v772_v50 = vpop.f32.mrb[25].mxu1 }
 0x328   :  { %v778_v52 = vadd.f32 %v731_v48, %v1916_v25  ;;  %v780_v53 = vadd.f32 %v772_v50, %v2292_v51  ;;  %v733_v54 = vpop.f32.mrb[26].mxu0  ;;  %v774_v55 = vpop.f32.mrb[26].mxu1  ;;  %v2294_v50 = vld [vmem:[#allocation14_spill] sm:$0xff] }
 0x329   :  { %v781_v0 = vmul.f32 0.5, %v777_v2  ;;  %v734_v56 = vpop.f32.mrb[27].mxu0  ;;  %v775_v58 = vpop.f32.mrb[27].mxu1  ;;  %v2295_v54 = vld [vmem:[#allocation15_spill] sm:$0xff] }
 0x32a   :  { %v785_v4 = vmul.f32 0.5, %v778_v52  ;;  %v790_v60 = vmul.f32 0.5, %v780_v53 }
 0x32b   :  { %1476 = vtanh.f32 %v781_v0  ;;  %v2296_v0 = vld [vmem:[#allocation16_spill] sm:$0xff] }
 0x32c   :  { %1478 = vtanh.f32 %v785_v4 }
 0x32d   :  { %1480 = vtanh.f32 %v779_v49  ;;  %v2293_v49 = vld [vmem:[#allocation13_spill] sm:$0xff] }
 0x32e   :  { %1482 = vtanh.f32 %v790_v60 }
 0x335   :  { %v1477_v45 = vpop.eup %1476 }
 0x336   :  { %v1479_v3 = vpop.eup %1478  ;;  %v783_v59 = vmul.f32 0.5, %v1477_v45 }
 0x337   :  { %v787_v5 = vmul.f32 0.5, %v1479_v3  ;;  %v1481_v14 = vpop.eup %1480 }
 0x338   :  { %v784_v62 = vadd.f32 0.5, %v783_v59  ;;  %v1483_v47 = vpop.eup %1482 }
 0x339   :  { %v788_v25 = vadd.f32 0.5, %v787_v5  ;;  %v792_v34 = vmul.f32 0.5, %v1483_v47 }
 0x33a   :  { %v795_v63 = vmul.f32 %v1481_v14, %v784_v62 }
 0x33b   :  { %v794_v44 = vmul.f32 %v788_v25, %v2017_v41  ;;  %v793_v42 = vadd.f32 0.5, %v792_v34 }
 0x33d   :  { %v2059_v43 = vadd.f32 %v795_v63, %v794_v44 }
 0x33f   :  { %1484 = vtanh.f32 %v2059_v43 }
 0x349   :  { %v1485_v46 = vpop.eup %1484 }
 0x34a   :  { %v798_v61 = vmul.f32 %v1485_v46, %v793_v42 }
 0x34c   :  { %v799_v57 = vpack.c.bf16 %v798_v61, %v798_v61 }
 0x34e   :  { %833 = vmatmul.mubr.bf16.vlgmr.msra.gmra.mrb[28].mxu0 %v799_v57  ;;  %874 = vmatmul.mubr.bf16.vlgmr.msra.gmra.mrb[28].mxu1 %v799_v57 }
 0x34f   :  { %906 = vmatpush1.bf16.msra.mxu0 %v1744_v8  ;;  %947 = vmatpush1.bf16.msra.mxu1 %v1747_v9 }
 0x350   :  { %907 = vmatprep.subr.bf16.mxu0 %v1751_v10  ;;  %948 = vmatprep.subr.bf16.mxu1 %v1755_v11 }
 0x351   :  { %937 = vmatprep.mubr.bf16.mxu0 %v2291_v1  ;;  %978 = vmatprep.mubr.bf16.mxu1 %v2291_v1 }
 0x353   :  { %908 = vmatpush1.bf16.msra.mxu0 %v1757_v12  ;;  %949 = vmatpush1.bf16.msra.mxu1 %v1759_v13 }
 0x354   :  { %909 = vmatprep.subr.bf16.mxu0 %v1765_v15  ;;  %950 = vmatprep.subr.bf16.mxu1 %v1768_v16 }
 0x357   :  { %910 = vmatpush1.bf16.msra.mxu0 %v1771_v17  ;;  %951 = vmatpush1.bf16.msra.mxu1 %v1773_v18 }
 0x358   :  { %911 = vmatprep.subr.bf16.mxu0 %v1777_v19  ;;  %952 = vmatprep.subr.bf16.mxu1 %v1780_v20 }
 0x35b   :  { %912 = vmatpush1.bf16.msra.mxu0 %v1784_v21  ;;  %953 = vmatpush1.bf16.msra.mxu1 %v1787_v22 }
 0x35c   :  { %913 = vmatprep.subr.bf16.mxu0 %v1792_v23  ;;  %954 = vmatprep.subr.bf16.mxu1 %v1796_v24 }
 0x35f   :  { %914 = vmatpush1.bf16.msra.mxu0 %v1799_v26  ;;  %955 = vmatpush1.bf16.msra.mxu1 %v1803_v27 }
 0x360   :  { %915 = vmatprep.subr.bf16.mxu0 %v1805_v28  ;;  %956 = vmatprep.subr.bf16.mxu1 %v1808_v29 }
 0x363   :  { %916 = vmatpush1.bf16.msra.mxu0 %v1813_v30  ;;  %957 = vmatpush1.bf16.msra.mxu1 %v1815_v31 }
 0x364   :  { %917 = vmatprep.subr.bf16.mxu0 %v1820_v32  ;;  %958 = vmatprep.subr.bf16.mxu1 %v1824_v33 }
 0x367   :  { %918 = vmatpush1.bf16.msra.mxu0 %v1827_v35  ;;  %959 = vmatpush1.bf16.msra.mxu1 %v1831_v36 }
 0x368   :  { %919 = vmatprep.subr.bf16.mxu0 %v1833_v37  ;;  %960 = vmatprep.subr.bf16.mxu1 %v1836_v38 }
 0x36b   :  { %920 = vmatpush1.bf16.msra.mxu0 %v1841_v39  ;;  %961 = vmatpush1.bf16.msra.mxu1 %v1846_v40 }
 0x36c   :  { %1010 = vmatprep.subr.bf16.mxu0 %v1740_v6  ;;  %1051 = vmatprep.subr.bf16.mxu1 %v1742_v7 }
 0x421   :  { %v834_v41 = vpop.f32.mrb[28].mxu0  ;;  %v875_v2 = vpop.f32.mrb[28].mxu1 }
 0x422   :  { %v882_v48 = vadd.f32 %v834_v41, %v2293_v49  ;;  %v884_v52 = vadd.f32 %v875_v2, %v2294_v50  ;;  %v836_v51 = vpop.f32.mrb[29].mxu0  ;;  %v877_v53 = vpop.f32.mrb[29].mxu1 }
 0x423   :  { %v883_v55 = vadd.f32 %v836_v51, %v2295_v54  ;;  %v885_v56 = vadd.f32 %v877_v53, %v2296_v0  ;;  %v838_v58 = vpop.f32.mrb[30].mxu0  ;;  %v879_v4 = vpop.f32.mrb[30].mxu1 }
 0x424   :  { %v886_v60 = vmul.f32 0.5, %v882_v48  ;;  %v839_v45 = vpop.f32.mrb[31].mxu0  ;;  %v880_v3 = vpop.f32.mrb[31].mxu1 }
 0x425   :  { %v890_v6 = vmul.f32 0.5, %v883_v55  ;;  %v895_v7 = vmul.f32 0.5, %v885_v56 }
 0x426   :  { %1486 = vtanh.f32 %v886_v60 }
 0x427   :  { %1488 = vtanh.f32 %v890_v6 }
 0x428   :  { %1490 = vtanh.f32 %v884_v52 }
 0x429   :  { %1492 = vtanh.f32 %v895_v7 }
 0x430   :  { %v1487_v59 = vpop.eup %1486 }
 0x431   :  { %v1489_v5 = vpop.eup %1488  ;;  %v888_v62 = vmul.f32 0.5, %v1487_v59 }
 0x432   :  { %v892_v14 = vmul.f32 0.5, %v1489_v5  ;;  %v1491_v63 = vpop.eup %1490 }
 0x433   :  { %v889_v25 = vadd.f32 0.5, %v888_v62  ;;  %v1493_v46 = vpop.eup %1492 }
 0x434   :  { %v893_v44 = vadd.f32 0.5, %v892_v14  ;;  %v897_v61 = vmul.f32 0.5, %v1493_v46  ;;  %v2170_v46 = vld [vmem:[#allocation7 + $0x44] ss:$16 sps:$4 sm:$0xff]  }
 0x435   :  { %v900_v47 = vmul.f32 %v1491_v63, %v889_v25  ;;  %v2150_v25 = vld [vmem:[#allocation7] ss:$16 sps:$4 sm:$0xff]   ;;  %v2153_v63 = vld [vmem:[#allocation7 + $0x8] ss:$16 sps:$4 sm:$0xff]  }
 0x436   :  { %v899_v34 = vmul.f32 %v893_v44, %v2059_v43  ;;  %v898_v57 = vadd.f32 0.5, %v897_v61  ;;  %v2156_v44 = vld [vmem:[#allocation7 + $0x24] ss:$16 sps:$4 sm:$0xff]   ;;  %v2173_v61 = vld [vmem:[#allocation7 + $0x4c] ss:$16 sps:$4 sm:$0xff]  }
 0x438   :  { %v2101_v42 = vadd.f32 %v900_v47, %v899_v34  ;;  %v2159_v47 = vld [vmem:[#allocation7 + $0x2c] ss:$16 sps:$4 sm:$0xff]   ;;  %v2164_v34 = vld [vmem:[#allocation7 + $0x20] ss:$16 sps:$4 sm:$0xff]  }
 0x43a   :  { %1494 = vtanh.f32 %v2101_v42 }
 0x444   :  { %v1495_v41 = vpop.eup %1494 }
 0x445   :  { %v903_v2 = vmul.f32 %v1495_v41, %v898_v57  ;;  %v2176_v57 = vld [vmem:[#allocation7 + $0x40] ss:$16 sps:$4 sm:$0xff]   ;;  %v2179_v41 = vld [vmem:[#allocation7 + $0x48] ss:$16 sps:$4 sm:$0xff]  }
 0x447   :  { %v904_v49 = vpack.c.bf16 %v903_v2, %v903_v2  ;;  %v2182_v2 = vld [vmem:[#allocation7 + $0x64] ss:$16 sps:$4 sm:$0xff]  }
 0x449   :  { %938 = vmatmul.mubr.bf16.vlgmr.msra.gmra.mrb[32].mxu0 %v904_v49  ;;  %979 = vmatmul.mubr.bf16.vlgmr.msra.gmra.mrb[32].mxu1 %v904_v49  ;;  %v2185_v49 = vld [vmem:[#allocation7 + $0x6c] ss:$16 sps:$4 sm:$0xff]  }
 0x44a   :  { %1011 = vmatpush1.bf16.msra.mxu0 %v1744_v8  ;;  %1052 = vmatpush1.bf16.msra.mxu1 %v1747_v9  ;;  %v2136_v8 = vld [vmem:[#allocation7 + $0x4] ss:$16 sps:$4 sm:$0xff]   ;;  %v2139_v9 = vld [vmem:[#allocation7 + $0xc] ss:$16 sps:$4 sm:$0xff]  }
 0x44b   :  { %1012 = vmatprep.subr.bf16.mxu0 %v1751_v10  ;;  %1053 = vmatprep.subr.bf16.mxu1 %v1755_v11 }
 0x44c   :  { %1042 = vmatprep.mubr.bf16.mxu0 %v2291_v1  ;;  %1083 = vmatprep.mubr.bf16.mxu1 %v2291_v1 }
 0x44e   :  { %1013 = vmatpush1.bf16.msra.mxu0 %v1757_v12  ;;  %1054 = vmatpush1.bf16.msra.mxu1 %v1759_v13  ;;  %v2297_v12 = vld [vmem:[#allocation17_spill] sm:$0xff] }
 0x44f   :  { %1014 = vmatprep.subr.bf16.mxu0 %v1765_v15  ;;  %1055 = vmatprep.subr.bf16.mxu1 %v1768_v16  ;;  %v2298_v15 = vld [vmem:[#allocation18_spill] sm:$0xff] }
 0x452   :  { %1015 = vmatpush1.bf16.msra.mxu0 %v1771_v17  ;;  %1056 = vmatpush1.bf16.msra.mxu1 %v1773_v18 }
 0x453   :  { %1016 = vmatprep.subr.bf16.mxu0 %v1777_v19  ;;  %1057 = vmatprep.subr.bf16.mxu1 %v1780_v20  ;;  %v2299_v19 = vld [vmem:[#allocation19_spill] sm:$0xff] }
 0x456   :  { %1017 = vmatpush1.bf16.msra.mxu0 %v1784_v21  ;;  %1058 = vmatpush1.bf16.msra.mxu1 %v1787_v22  ;;  %v2300_v21 = vld [vmem:[#allocation20_spill] sm:$0xff] }
 0x457   :  { %1018 = vmatprep.subr.bf16.mxu0 %v1792_v23  ;;  %1059 = vmatprep.subr.bf16.mxu1 %v1796_v24 }
 0x45a   :  { %1019 = vmatpush1.bf16.msra.mxu0 %v1799_v26  ;;  %1060 = vmatpush1.bf16.msra.mxu1 %v1803_v27 }
 0x45b   :  { %1020 = vmatprep.subr.bf16.mxu0 %v1805_v28  ;;  %1061 = vmatprep.subr.bf16.mxu1 %v1808_v29 }
 0x45e   :  { %1021 = vmatpush1.bf16.msra.mxu0 %v1813_v30  ;;  %1062 = vmatpush1.bf16.msra.mxu1 %v1815_v31 }
 0x45f   :  { %1022 = vmatprep.subr.bf16.mxu0 %v1820_v32  ;;  %1063 = vmatprep.subr.bf16.mxu1 %v1824_v33 }
 0x462   :  { %1023 = vmatpush1.bf16.msra.mxu0 %v1827_v35  ;;  %1064 = vmatpush1.bf16.msra.mxu1 %v1831_v36 }
 0x463   :  { %1024 = vmatprep.subr.bf16.mxu0 %v1833_v37  ;;  %1065 = vmatprep.subr.bf16.mxu1 %v1836_v38 }
 0x466   :  { %1025 = vmatpush1.bf16.msra.mxu0 %v1841_v39  ;;  %1066 = vmatpush1.bf16.msra.mxu1 %v1846_v40 }
 0x467   :  { %1115 = vmatprep.subr.bf16.mxu0 %v2136_v8  ;;  %1156 = vmatprep.subr.bf16.mxu1 %v2139_v9 }
 0x51c   :  { %v939_v10 = vpop.f32.mrb[32].mxu0  ;;  %v980_v11 = vpop.f32.mrb[32].mxu1 }
 0x51d   :  { %v987_v13 = vadd.f32 %v939_v10, %v2297_v12  ;;  %v989_v16 = vadd.f32 %v980_v11, %v2298_v15  ;;  %v941_v17 = vpop.f32.mrb[33].mxu0  ;;  %v982_v18 = vpop.f32.mrb[33].mxu1  ;;  %v2188_v10 = vld [vmem:[#allocation7 + $0x60] ss:$16 sps:$4 sm:$0xff]   ;;  %v2191_v11 = vld [vmem:[#allocation7 + $0x68] ss:$16 sps:$4 sm:$0xff]  }
 0x51e   :  { %v988_v20 = vadd.f32 %v941_v17, %v2299_v19  ;;  %v990_v22 = vadd.f32 %v982_v18, %v2300_v21  ;;  %v943_v23 = vpop.f32.mrb[34].mxu0  ;;  %v984_v24 = vpop.f32.mrb[34].mxu1  ;;  %v2194_v12 = vld [vmem:[#allocation7 + $0x84] ss:$16 sps:$4 sm:$0xff]  }
 0x51f   :  { %v991_v43 = vmul.f32 0.5, %v987_v13  ;;  %v944_v48 = vpop.f32.mrb[35].mxu0  ;;  %v985_v50 = vpop.f32.mrb[35].mxu1  ;;  %v2197_v13 = vld [vmem:[#allocation7 + $0x8c] ss:$16 sps:$4 sm:$0xff]  }
 0x520   :  { %v995_v52 = vmul.f32 0.5, %v988_v20  ;;  %v1000_v51 = vmul.f32 0.5, %v990_v22 }
 0x521   :  { %1496 = vtanh.f32 %v991_v43 }
 0x522   :  { %1498 = vtanh.f32 %v995_v52 }
 0x523   :  { %1500 = vtanh.f32 %v989_v16 }
 0x524   :  { %1502 = vtanh.f32 %v1000_v51 }
 0x52b   :  { %v1497_v53 = vpop.eup %1496 }
 0x52c   :  { %v1499_v54 = vpop.eup %1498  ;;  %v993_v55 = vmul.f32 0.5, %v1497_v53 }
 0x52d   :  { %v997_v0 = vmul.f32 0.5, %v1499_v54  ;;  %v1501_v58 = vpop.eup %1500 }
 0x52e   :  { %v994_v56 = vadd.f32 0.5, %v993_v55  ;;  %v1503_v6 = vpop.eup %1502 }
 0x52f   :  { %v998_v4 = vadd.f32 0.5, %v997_v0  ;;  %v1002_v7 = vmul.f32 0.5, %v1503_v6  ;;  %v1561_v6 = vld [vmem:[#allocation7 + $0xcc] ss:$16 sps:$4 sm:$0xff]  }
 0x530   :  { %v1005_v60 = vmul.f32 %v1501_v58, %v994_v56  ;;  %v1555_v56 = vld [vmem:[#allocation7 + $0x88] ss:$16 sps:$4 sm:$0xff]   ;;  %v1556_v58 = vld [vmem:[#allocation7 + $0xa4] ss:$16 sps:$4 sm:$0xff]  }
 0x531   :  { %v1004_v45 = vmul.f32 %v998_v4, %v2101_v42  ;;  %v1003_v59 = vadd.f32 0.5, %v1002_v7  ;;  %v2167_v42 = vld [vmem:[#allocation7 + $0x28] ss:$16 sps:$4 sm:$0xff]   ;;  %v1557_v4 = vld [vmem:[#allocation7 + $0xac] ss:$16 sps:$4 sm:$0xff]  }
 0x532   :  { %v1562_v7 = vld [vmem:[#allocation7 + $0xc0] ss:$16 sps:$4 sm:$0xff]  }
 0x533   :  { %v2147_v3 = vadd.f32 %v1005_v60, %v1004_v45  ;;  %v1558_v60 = vld [vmem:[#allocation7 + $0xa0] ss:$16 sps:$4 sm:$0xff]   ;;  %v1559_v45 = vld [vmem:[#allocation7 + $0xa8] ss:$16 sps:$4 sm:$0xff]  }
 0x535   :  { %1504 = vtanh.f32 %v2147_v3 }
 0x53f   :  { %v1505_v5 = vpop.eup %1504 }
 0x540   :  { %v1008_v62 = vmul.f32 %v1505_v5, %v1003_v59  ;;  %v1563_v59 = vld [vmem:[#allocation7 + $0xc8] ss:$16 sps:$4 sm:$0xff]   ;;  %v1564_v5 = vld [vmem:[#allocation7 + $0xe4] ss:$16 sps:$4 sm:$0xff]  }
 0x542   :  { %v1009_v14 = vpack.c.bf16 %v1008_v62, %v1008_v62  ;;  %v1565_v62 = vld [vmem:[#allocation7 + $0xec] ss:$16 sps:$4 sm:$0xff]  }
 0x544   :  { %1043 = vmatmul.mubr.bf16.vlgmr.msra.gmra.mrb[36].mxu0 %v1009_v14  ;;  %1084 = vmatmul.mubr.bf16.vlgmr.msra.gmra.mrb[36].mxu1 %v1009_v14  ;;  %v1566_v14 = vld [vmem:[#allocation7 + $0xe0] ss:$16 sps:$4 sm:$0xff]  }
 0x545   :  { %1116 = vmatpush1.bf16.msra.mxu0 %v2150_v25  ;;  %1157 = vmatpush1.bf16.msra.mxu1 %v2153_v63 }
 0x546   :  { %1117 = vmatprep.subr.bf16.mxu0 %v2156_v44  ;;  %1158 = vmatprep.subr.bf16.mxu1 %v2159_v47 }
 0x547   :  { %1147 = vmatprep.mubr.bf16.mxu0 %v2291_v1  ;;  %1188 = vmatprep.mubr.bf16.mxu1 %v2291_v1 }
 0x549   :  { %1118 = vmatpush1.bf16.msra.mxu0 %v2164_v34  ;;  %1159 = vmatpush1.bf16.msra.mxu1 %v2167_v42 }
 0x54a   :  { %1119 = vmatprep.subr.bf16.mxu0 %v2170_v46  ;;  %1160 = vmatprep.subr.bf16.mxu1 %v2173_v61 }
 0x54d   :  { %1120 = vmatpush1.bf16.msra.mxu0 %v2176_v57  ;;  %1161 = vmatpush1.bf16.msra.mxu1 %v2179_v41 }
 0x54e   :  { %1121 = vmatprep.subr.bf16.mxu0 %v2182_v2  ;;  %1162 = vmatprep.subr.bf16.mxu1 %v2185_v49 }
 0x551   :  { %1122 = vmatpush1.bf16.msra.mxu0 %v2188_v10  ;;  %1163 = vmatpush1.bf16.msra.mxu1 %v2191_v11 }
 0x552   :  { %1123 = vmatprep.subr.bf16.mxu0 %v2194_v12  ;;  %1164 = vmatprep.subr.bf16.mxu1 %v2197_v13 }
 0x555   :  { %1124 = vmatpush1.bf16.msra.mxu0 %v1799_v26  ;;  %1165 = vmatpush1.bf16.msra.mxu1 %v1803_v27 }
 0x556   :  { %1125 = vmatprep.subr.bf16.mxu0 %v1805_v28  ;;  %1166 = vmatprep.subr.bf16.mxu1 %v1808_v29  ;;  %v2301_v28 = vld [vmem:[#allocation21_spill] sm:$0xff] }
 0x559   :  { %1126 = vmatpush1.bf16.msra.mxu0 %v1813_v30  ;;  %1167 = vmatpush1.bf16.msra.mxu1 %v1815_v31  ;;  %v2302_v30 = vld [vmem:[#allocation22_spill] sm:$0xff] }
 0x55a   :  { %1127 = vmatprep.subr.bf16.mxu0 %v1820_v32  ;;  %1168 = vmatprep.subr.bf16.mxu1 %v1824_v33 }
 0x55d   :  { %1128 = vmatpush1.bf16.msra.mxu0 %v1827_v35  ;;  %1169 = vmatpush1.bf16.msra.mxu1 %v1831_v36  ;;  %v2303_v35 = vld [vmem:[#allocation23_spill] sm:$0xff] }
 0x55e   :  { %1129 = vmatprep.subr.bf16.mxu0 %v1833_v37  ;;  %1170 = vmatprep.subr.bf16.mxu1 %v1836_v38  ;;  %v2304_v37 = vld [vmem:[#allocation24_spill] sm:$0xff] }
 0x561   :  { %1130 = vmatpush1.bf16.msra.mxu0 %v1841_v39  ;;  %1171 = vmatpush1.bf16.msra.mxu1 %v1846_v40 }
 0x562   :  { %1220 = vmatprep.subr.bf16.mxu0 %v2136_v8  ;;  %1261 = vmatprep.subr.bf16.mxu1 %v2139_v9 }
 0x617   :  { %v1044_v26 = vpop.f32.mrb[36].mxu0  ;;  %v1085_v27 = vpop.f32.mrb[36].mxu1 }
 0x618   :  { %v1092_v29 = vadd.f32 %v1044_v26, %v2301_v28  ;;  %v1094_v31 = vadd.f32 %v1085_v27, %v2302_v30  ;;  %v1046_v32 = vpop.f32.mrb[37].mxu0  ;;  %v1087_v33 = vpop.f32.mrb[37].mxu1 }
 0x619   :  { %v1093_v36 = vadd.f32 %v1046_v32, %v2303_v35  ;;  %v1095_v38 = vadd.f32 %v1087_v33, %v2304_v37  ;;  %v1048_v15 = vpop.f32.mrb[38].mxu0  ;;  %v1089_v39 = vpop.f32.mrb[38].mxu1 }
 0x61a   :  { %v1096_v16 = vmul.f32 0.5, %v1092_v29  ;;  %v1049_v40 = vpop.f32.mrb[39].mxu0  ;;  %v1090_v17 = vpop.f32.mrb[39].mxu1 }
 0x61b   :  { %v1100_v8 = vmul.f32 0.5, %v1093_v36  ;;  %v1105_v9 = vmul.f32 0.5, %v1095_v38 }
 0x61c   :  { %1506 = vtanh.f32 %v1096_v16 }
 0x61d   :  { %1508 = vtanh.f32 %v1100_v8 }
 0x61e   :  { %1510 = vtanh.f32 %v1094_v31 }
 0x61f   :  { %1512 = vtanh.f32 %v1105_v9 }
 0x626   :  { %v1507_v18 = vpop.eup %1506 }
 0x627   :  { %v1509_v19 = vpop.eup %1508  ;;  %v1098_v20 = vmul.f32 0.5, %v1507_v18 }
 0x628   :  { %v1102_v21 = vmul.f32 0.5, %v1509_v19  ;;  %v1511_v23 = vpop.eup %1510 }
 0x629   :  { %v1099_v22 = vadd.f32 0.5, %v1098_v20  ;;  %v1513_v52 = vpop.eup %1512 }
 0x62a   :  { %v1103_v24 = vadd.f32 0.5, %v1102_v21  ;;  %v1107_v51 = vmul.f32 0.5, %v1513_v52  ;;  %v2309_v21 = vld [vmem:[#allocation29_spill] sm:$0xff]  ;;  %v2311_v52 = vld [vmem:[#allocation31_spill] sm:$0xff] }
 0x62b   :  { %v1110_v43 = vmul.f32 %v1511_v23, %v1099_v22  ;;  %v2310_v23 = vld [vmem:[#allocation30_spill] sm:$0xff] }
 0x62c   :  { %v1109_v48 = vmul.f32 %v1103_v24, %v2147_v3  ;;  %v1108_v53 = vadd.f32 0.5, %v1107_v51  ;;  %v1560_v3 = vld [vmem:[#allocation7 + $0xc4] ss:$16 sps:$4 sm:$0xff]   ;;  %v2312_v51 = vld [vmem:[#allocation32_spill] sm:$0xff] }
 0x62e   :  { %v2221_v50 = vadd.f32 %v1110_v43, %v1109_v48 }
 0x630   :  { %1514 = vtanh.f32 %v2221_v50 }
 0x63a   :  { %v1515_v54 = vpop.eup %1514 }
 0x63b   :  { %v1113_v55 = vmul.f32 %v1515_v54, %v1108_v53 }
 0x63d   :  { %v1114_v0 = vpack.c.bf16 %v1113_v55, %v1113_v55 }
 0x63f   :  { %1148 = vmatmul.mubr.bf16.vlgmr.msra.gmra.mrb[40].mxu0 %v1114_v0  ;;  %1189 = vmatmul.mubr.bf16.vlgmr.msra.gmra.mrb[40].mxu1 %v1114_v0 }
 0x640   :  { %1221 = vmatpush1.bf16.msra.mxu0 %v2150_v25  ;;  %1262 = vmatpush1.bf16.msra.mxu1 %v2153_v63  ;;  %v1567_v25 = vld [vmem:[#allocation7 + $0xe8] ss:$16 sps:$4 sm:$0xff]  }
 0x641   :  { %1222 = vmatprep.subr.bf16.mxu0 %v2156_v44  ;;  %1263 = vmatprep.subr.bf16.mxu1 %v2159_v47  ;;  %v2305_v47 = vld [vmem:[#allocation25_spill] sm:$0xff] }
 0x642   :  { %1252 = vmatprep.mubr.bf16.mxu0 %v2291_v1  ;;  %1293 = vmatprep.mubr.bf16.mxu1 %v2291_v1  ;;  %v1554_v1 = vld [vmem:[#allocation7 + $0x80] ss:$16 sps:$4 sm:$0xff]  }
 0x644   :  { %1223 = vmatpush1.bf16.msra.mxu0 %v2164_v34  ;;  %1264 = vmatpush1.bf16.msra.mxu1 %v2167_v42  ;;  %v2306_v42 = vld [vmem:[#allocation26_spill] sm:$0xff] }
 0x645   :  { %1224 = vmatprep.subr.bf16.mxu0 %v2170_v46  ;;  %1265 = vmatprep.subr.bf16.mxu1 %v2173_v61 }
 0x648   :  { %1225 = vmatpush1.bf16.msra.mxu0 %v2176_v57  ;;  %1266 = vmatpush1.bf16.msra.mxu1 %v2179_v41  ;;  %v2307_v41 = vld [vmem:[#allocation27_spill] sm:$0xff] }
 0x649   :  { %1226 = vmatprep.subr.bf16.mxu0 %v2182_v2  ;;  %1267 = vmatprep.subr.bf16.mxu1 %v2185_v49  ;;  %v2308_v49 = vld [vmem:[#allocation28_spill] sm:$0xff] }
 0x64c   :  { %1227 = vmatpush1.bf16.msra.mxu0 %v2188_v10  ;;  %1268 = vmatpush1.bf16.msra.mxu1 %v2191_v11 }
 0x64d   :  { %1228 = vmatprep.subr.bf16.mxu0 %v2194_v12  ;;  %1269 = vmatprep.subr.bf16.mxu1 %v2197_v13 }
 0x650   :  { %1229 = vmatpush1.bf16.msra.mxu0 %v1554_v1  ;;  %1270 = vmatpush1.bf16.msra.mxu1 %v1555_v56 }
 0x651   :  { %1230 = vmatprep.subr.bf16.mxu0 %v1556_v58  ;;  %1271 = vmatprep.subr.bf16.mxu1 %v1557_v4 }
 0x654   :  { %1231 = vmatpush1.bf16.msra.mxu0 %v1558_v60  ;;  %1272 = vmatpush1.bf16.msra.mxu1 %v1559_v45 }
 0x655   :  { %1232 = vmatprep.subr.bf16.mxu0 %v1560_v3  ;;  %1273 = vmatprep.subr.bf16.mxu1 %v1561_v6 }
 0x658   :  { %1233 = vmatpush1.bf16.msra.mxu0 %v1562_v7  ;;  %1274 = vmatpush1.bf16.msra.mxu1 %v1563_v59 }
 0x659   :  { %1234 = vmatprep.subr.bf16.mxu0 %v1564_v5  ;;  %1275 = vmatprep.subr.bf16.mxu1 %v1565_v62 }
 0x65c   :  { %1235 = vmatpush1.bf16.msra.mxu0 %v1566_v14  ;;  %1276 = vmatpush1.bf16.msra.mxu1 %v1567_v25 }
 0x712   :  { %v1149_v63 = vpop.f32.mrb[40].mxu0  ;;  %v1190_v44 = vpop.f32.mrb[40].mxu1 }
 0x713   :  { %v1197_v34 = vadd.f32 %v1149_v63, %v2305_v47  ;;  %v1199_v46 = vadd.f32 %v1190_v44, %v2306_v42  ;;  %v1151_v61 = vpop.f32.mrb[41].mxu0  ;;  %v1192_v57 = vpop.f32.mrb[41].mxu1 }
 0x714   :  { %v1198_v2 = vadd.f32 %v1151_v61, %v2307_v41  ;;  %v1200_v10 = vadd.f32 %v1192_v57, %v2308_v49  ;;  %v1153_v11 = vpop.f32.mrb[42].mxu0  ;;  %v1194_v12 = vpop.f32.mrb[42].mxu1 }
 0x715   :  { %v1201_v13 = vmul.f32 0.5, %v1197_v34  ;;  %v1154_v26 = vpop.f32.mrb[43].mxu0  ;;  %v1195_v27 = vpop.f32.mrb[43].mxu1 }
 0x716   :  { %v1205_v28 = vmul.f32 0.5, %v1198_v2  ;;  %v1210_v29 = vmul.f32 0.5, %v1200_v10 }
 0x717   :  { %1516 = vtanh.f32 %v1201_v13 }
 0x718   :  { %1518 = vtanh.f32 %v1205_v28 }
 0x719   :  { %1520 = vtanh.f32 %v1199_v46 }
 0x71a   :  { %1522 = vtanh.f32 %v1210_v29 }
 0x721   :  { %v1517_v30 = vpop.eup %1516 }
 0x722   :  { %v1519_v31 = vpop.eup %1518  ;;  %v1203_v32 = vmul.f32 0.5, %v1517_v30 }
 0x723   :  { %v1207_v33 = vmul.f32 0.5, %v1519_v31  ;;  %v1521_v36 = vpop.eup %1520 }
 0x724   :  { %v1204_v35 = vadd.f32 0.5, %v1203_v32  ;;  %v1523_v16 = vpop.eup %1522 }
 0x725   :  { %v1208_v37 = vadd.f32 0.5, %v1207_v33  ;;  %v1212_v40 = vmul.f32 0.5, %v1523_v16 }
 0x726   :  { %v1215_v38 = vmul.f32 %v1521_v36, %v1204_v35 }
 0x727   :  { %v1214_v15 = vmul.f32 %v1208_v37, %v2221_v50  ;;  %v1213_v17 = vadd.f32 0.5, %v1212_v40 }
 0x729   :  { %v1216_v39 = vadd.f32 %v1215_v38, %v1214_v15 }
 0x72b   :  { %1524 = vtanh.f32 %v1216_v39 }
 0x735   :  { %v1525_v8 = vpop.eup %1524 }
 0x736   :  { %v1218_v9 = vmul.f32 %v1525_v8, %v1213_v17 }
 0x738   :  { %v1219_v18 = vpack.c.bf16 %v1218_v9, %v1218_v9 }
 0x73a   :  { %1253 = vmatmul.mubr.bf16.vlgmr.msra.gmra.mrb[44].mxu0 %v1219_v18  ;;  %1294 = vmatmul.mubr.bf16.vlgmr.msra.gmra.mrb[44].mxu1 %v1219_v18 }
 0x80d   :  { %v1254_v19 = vpop.f32.mrb[44].mxu0  ;;  %v1295_v20 = vpop.f32.mrb[44].mxu1 }
 0x80e   :  { %v1302_v22 = vadd.f32 %v1254_v19, %v2309_v21  ;;  %v1304_v24 = vadd.f32 %v1295_v20, %v2310_v23  ;;  %v1256_v43 = vpop.f32.mrb[45].mxu0  ;;  %v1297_v48 = vpop.f32.mrb[45].mxu1 }
 0x80f   :  { %v1303_v50 = vadd.f32 %v1256_v43, %v2311_v52  ;;  %v1305_v53 = vadd.f32 %v1297_v48, %v2312_v51  ;;  %v1258_v54 = vpop.f32.mrb[46].mxu0  ;;  %v1299_v55 = vpop.f32.mrb[46].mxu1 }
 0x810   :  { %v1306_v0 = vmul.f32 0.5, %v1302_v22  ;;  %v1259_v1 = vpop.f32.mrb[47].mxu0  ;;  %v1300_v56 = vpop.f32.mrb[47].mxu1 }
 0x811   :  { %v1310_v58 = vmul.f32 0.5, %v1303_v50  ;;  %v1315_v4 = vmul.f32 0.5, %v1305_v53 }
 0x812   :  { %1526 = vtanh.f32 %v1306_v0 }
 0x813   :  { %1528 = vtanh.f32 %v1310_v58 }
 0x814   :  { %1530 = vtanh.f32 %v1304_v24 }
 0x815   :  { %1532 = vtanh.f32 %v1315_v4 }
 0x81c   :  { %v1527_v60 = vpop.eup %1526 }
 0x81d   :  { %v1529_v45 = vpop.eup %1528  ;;  %v1308_v3 = vmul.f32 0.5, %v1527_v60 }
 0x81e   :  { %v1312_v6 = vmul.f32 0.5, %v1529_v45  ;;  %v1531_v59 = vpop.eup %1530 }
 0x81f   :  { %v1309_v7 = vadd.f32 0.5, %v1308_v3  ;;  %v1533_v63 = vpop.eup %1532 }
 0x820   :  { %v1313_v5 = vadd.f32 0.5, %v1312_v6  ;;  %v1317_v44 = vmul.f32 0.5, %v1533_v63 }
 0x821   :  { %v1320_v62 = vmul.f32 %v1531_v59, %v1309_v7 }
 0x822   :  { %v1319_v14 = vmul.f32 %v1313_v5, %v1216_v39  ;;  %v1318_v47 = vadd.f32 0.5, %v1317_v44 }
 0x824   :  { %v1321_v25 = vadd.f32 %v1320_v62, %v1319_v14 }
 0x826   :  { %1534 = vtanh.f32 %v1321_v25 }
 0x830   :  { %v1535_v34 = vpop.eup %1534 }
 0x831   :  { %v1323_v42 = vmul.f32 %v1535_v34, %v1318_v47 }
 0x833   :  { %1324 = vst [vmem:[#allocation8] sm:$0xff] %v1323_v42 }
 0x834   :  { %1645 = shalt.err (!%p1642_p0)
}
 0x835   :  { %s1646_s6 = scalar_lea.hbm %s2267_s4, 128 }
 0x836   :  { %p1647_p1 = scmp.ne.s32.totalorder %s2267_s4, %s1646_s6  ;;  %p1650_p2 = scmp.lt.u32.totalorder %s1646_s6, %s2267_s4 }
 0x838   :  { %p1652_p3 = pnand %p1650_p2, %p1647_p1 }
 0x83a   :  { %1655 = shalt.err (!%p1652_p3)
}
 0x83b   :  { %1334 = dma.vmem_to_hbm [thread:$0]  %s1332_s26, 128, %s2267_s4, [#allocation4]  }
 0x83c   :  { %1660 = dma.done.wait [#allocation4], 128  }
 0x83d   :  { %1661 = vsyncadd [#allocation4], 4294967168 }
 0x83e   :  { %1338 = vsyncpa [#allocation3], 1 }
 0x83f   :  { %1339 = vsyncpa [#allocation6], 1 }
 0x840   :  { %1340 = vsyncpa [#allocation4], 1 }

</bundles_post_ra>
